<compile_context>
chip_gen: v5e
topology: v5e:2x2
jax: 0.10.0
libtpu: 0.0.40
codegen_flags: <defaults>
</compile_context>

<pallas_src>
import math

import numpy as np
import jax
import jax.numpy as jnp
from jax import lax
from jax.experimental import pallas as pl
from jax.experimental.pallas import tpu as pltpu

# flif_neuron constants (from the PyTorch module)
ALPHA = 0.2
DT = 1.0
THRESH = -50.0
V_INIT = -70.0
VL = -70.0
V_RESET = -70.0
GL = 0.025
CM = 0.5

# Per-regime coefficients of the unified membrane update
#   V_new = V_old + a_v * (VL - V_old) + a_i * I - memory_V
A_V1 = DT * GL / CM                                    # N == 1  (dt / tau)
A_I1 = DT / CM
_C = (DT ** ALPHA) * math.gamma(2.0 - ALPHA) / CM      # N >= 2
A_V2 = _C * GL
A_I2 = _C

PAD = 128   # lane-packed feature width (hidden | output | zero padding)


# ----------------------------------------------------------------------------
# Fused Pallas kernel: the full T-step FSNN recurrence in one invocation.
# ----------------------------------------------------------------------------
def _fsnn_seq_kernel(xs_ref, wpad_ref, w_in_ref, b_in_ref, wo_ref,
                     spk_ref, mem_ref, delta_ref):
    f32 = jnp.float32
    T = xs_ref.shape[0]
    P = spk_ref.shape[1]

    def dot(a, b):
        # Exact-f32 matmul: latency-bound at M=1, and the strict spike-equality
        # verification needs the exact path.
        return jnp.dot(a, b, precision=lax.Precision.HIGHEST,
                       preferred_element_type=f32)

    # Hoisted, batched x-dependent currents for BOTH layers (one M=T dot,
    # instead of two M=1 dots on the serial chain of every step).
    # Lanes [0:n_hid]          : x @ Wh.T + bh
    # Lanes [n_hid:n_hid+n_out]: x @ Ws.T + (bo + bs)
    i_x_all = dot(xs_ref[...], w_in_ref[...]) + b_in_ref[...]        # (T, P)

    wo = wo_ref[...]                                                 # (P, P)

    # ---- step t = 0 : flif N == 0 branch (ignore I, set V_init, no spikes) ----
    delta_ref[...] = jnp.zeros_like(delta_ref)
    v = jnp.full((1, P), V_INIT, f32)
    spk_ref[0:1, :] = jnp.zeros((1, P), f32)
    mem_ref[0:1, :] = v

    # ---- steps 1 .. T-1 : fully unrolled (T static & tiny), all indices static ----
    for t in range(1, T):
        a_v = A_V1 if t == 1 else A_V2        # constant-folded regime select
        a_i = A_I1 if t == 1 else A_I2

        # Spikes for BOTH layers depend only on v_old -> compute before any dot;
        # the hidden lanes feed this step's output-layer current.
        spike = (v - THRESH > 0.0).astype(f32)                       # (1, P)

        # The single remaining per-step MXU dot: hidden spikes -> output current.
        i_tot = i_x_all[t:t + 1, :] + dot(spike, wo)                 # (1, P)

        # Fractional memory: VPU multiply + XLU sublane reduce over the
        # (tottime, P) delta trace (off the MXU; wpad row t is zero-padded so
        # only the first t-1 history rows contribute, and rows 0..1 are zero).
        mem_frac = jnp.sum(wpad_ref[t] * delta_ref[...],
                           axis=0, keepdims=True)                    # (1, P)

        v_new = v + a_v * (VL - v) + a_i * i_tot - mem_frac
        v_new = v_new - spike * (v_new - V_RESET)

        # Single lane-dense row stores (static sublane index).
        delta_ref[t - 1:t, :] = v_new - v
        spk_ref[t:t + 1, :] = spike
        mem_ref[t:t + 1, :] = v_new
        v = v_new


def make_fsnn_sequence_fn(n_in, T, tottime, P=PAD):
    f32 = jnp.float32
    vmem = pl.BlockSpec(memory_space=pltpu.MemorySpace.VMEM)
    out_shape = (
        jax.ShapeDtypeStruct((T, P), f32),   # packed spikes per step
        jax.ShapeDtypeStruct((T, P), f32),   # packed membranes per step
    )
    call = pl.pallas_call(
        _fsnn_seq_kernel,
        out_shape=out_shape,
        in_specs=[vmem] * 5,
        out_specs=(vmem, vmem),
        scratch_shapes=[pltpu.VMEM((tottime, P), f32)],   # packed delta trace
    )
    return jax.jit(call)


# ----------------------------------------------------------------------------
# Host-side one-time glue (no per-step host work)
# ----------------------------------------------------------------------------
def pack_params(params, n_in, n_hid, n_out, P=PAD):
    """Pack hidden+output layers onto one 128-lane axis (done once, host-side)."""
    w_in = np.zeros((n_in, P), np.float32)
    w_in[:, :n_hid] = np.asarray(params["wh_t"])
    w_in[:, n_hid:n_hid + n_out] = np.asarray(params["ws_t"])
    b_in = np.zeros((1, P), np.float32)
    b_in[0, :n_hid] = np.asarray(params["bh"])[0]
    b_in[0, n_hid:n_hid + n_out] = (np.asarray(params["bo"])[0]
                                    + np.asarray(params["bs"])[0])
    wo = np.zeros((P, P), np.float32)
    wo[:n_hid, n_hid:n_hid + n_out] = np.asarray(params["wo_t"])
    return jnp.asarray(w_in), jnp.asarray(b_in), jnp.asarray(wo)


def build_wpad_table(wv, tottime, T, P=PAD):
    """Row t = zero-padded fractional weights (flif counter N == t), pre-broadcast
    to the packed lane width so the in-kernel reduce needs no broadcast/transpose."""
    wpad = np.zeros((T, tottime, P), np.float32)
    for t in range(2, T):
        wpad[t, :t - 1, :] = wv[-(t - 1):][:, None]
    return jnp.asarray(wpad)


def fsnn_forward_sequence(params, xs, wv, tottime, n_hid, n_out):
    """Run the full FSNN sequence (from reset state) in one fused kernel call."""
    xs = jnp.asarray(xs, jnp.float32)
    T, n_in = xs.shape
    assert T <= tottime, "delta trace holds at most `tottime` history rows"
    w_in, b_in, wo = pack_params(params, n_in, n_hid, n_out)
    wpad_tbl = build_wpad_table(np.asarray(wv, np.float32), tottime, T)
    fn = make_fsnn_sequence_fn(n_in, T, tottime)
    spk, mem = fn(xs, wpad_tbl, w_in, b_in, wo)
    hid_spk = spk[:, :n_hid]
    out_spk = spk[:, n_hid:n_hid + n_out]
    hid_mem = mem[:, :n_hid]
    out_mem = mem[:, n_hid:n_hid + n_out]
    return hid_spk, out_spk, hid_mem, out_mem


# ----------------------------------------------------------------------------
# Parameter init (mirrors FSNN.__init__ weight transforms, deterministic)
# ----------------------------------------------------------------------------
def init_params(key, n_in, n_hid, n_out):
    keys = jax.random.split(key, 6)

    def lin(kw, kb, fan_in, fan_out):
        bound = 1.0 / math.sqrt(fan_in)
        W = jax.random.uniform(kw, (fan_out, fan_in), jnp.float32,
                               minval=-bound, maxval=bound)
        b = jax.random.uniform(kb, (fan_out,), jnp.float32,
                               minval=-bound, maxval=bound)
        return W, b

    Wh, bh = lin(keys[0], keys[1], n_in, n_hid)
    Wo, bo = lin(keys[2], keys[3], n_hid, n_out)
    Ws, bs = lin(keys[4], keys[5], n_in, n_out)
    Wh = jnp.abs(Wh * 10.0)    # forward_hidden
    Wo = jnp.abs(Wo * 30.0)    # forward_output
    Ws = jnp.abs(Ws * 7.5)     # forward_skip
    # NOTE: the feedback Linear weight is abs(W*0) = 0 and is only applied on
    # the very first forward, where the flif neuron ignores its input current,
    # so it can never affect the output; it is therefore omitted here.
    # TODO(synk): Learner.update / weight_change — the Learner class is not
    # provided in the reference source; it does not affect the forward output.
    return dict(wh_t=Wh.T, bh=bh[None, :],
                wo_t=Wo.T, bo=bo[None, :],
                ws_t=Ws.T, bs=bs[None, :])


# ----------------------------------------------------------------------------
# NumPy reference that mirrors the PyTorch module exactly (for verification)
# ----------------------------------------------------------------------------
def _ref_flif(I, st, tottime, wv):
    N = st["N"]
    V_old = st["mem"]
    if N == 0:
        st["mem"] = np.full_like(V_old, V_INIT)
        st["N"] = 1
        return np.zeros_like(V_old), st
    if N == 1:
        tau = CM / GL
        V_new = V_old + DT / tau * (-(V_old - VL) + I / GL)
    else:
        V_new = DT ** ALPHA * math.gamma(2 - ALPHA) * (-GL * (V_old - VL) + I) / CM + V_old
        memory_V = st["delta"][:, 0:N - 1] @ wv[-(N - 1):]
        V_new = V_new - memory_V
    spike = (V_old - THRESH > 0).astype(np.float32)
    V_new = V_new - spike * (V_new - V_RESET)
    st["delta"][:, N - 1] = V_new - V_old
    st["mem"] = V_new.astype(np.float32)
    st["N"] = N + 1
    return spike, st


def ref_run(pnp, xs, n_hid, n_out, tottime, wv):
    hid = dict(N=0, mem=np.zeros(n_hid, np.float32),
               delta=np.zeros((n_hid, tottime), np.float32))
    out = dict(N=0, mem=np.zeros(n_out, np.float32),
               delta=np.zeros((n_out, tottime), np.float32))
    results = []
    for x in xs:
        hid_I = pnp["Wh"] @ x + pnp["bh"]              # feedback weights are 0
        spk_h, hid = _ref_flif(hid_I, hid, tottime, wv)
        out_I = pnp["Wo"] @ spk_h + pnp["bo"] + pnp["Ws"] @ x + pnp["bs"]
        spk_o, out = _ref_flif(out_I, out, tottime, wv)
        results.append((spk_h, hid["mem"].copy(), spk_o, out["mem"].copy()))
    return results


# ----------------------------------------------------------------------------
if __name__ == "__main__":
    n_in, n_hid, n_out = 16, 32, 8
    num_steps, thinking_time = 2, 4
    tottime = num_steps * thinking_time                # flif history length

    key = jax.random.PRNGKey(0)
    kp, kx = jax.random.split(key)
    params = init_params(kp, n_in, n_hid, n_out)

    # flif_neuron.weight_vector
    nv = np.arange(tottime - 1)
    wv = (((tottime + 1 - nv) ** (1 - ALPHA))
          - ((tottime - nv) ** (1 - ALPHA))).astype(np.float32)

    T = 6
    xs = (jax.random.uniform(kx, (T, n_in)) < 0.4).astype(jnp.float32)

    # One fused kernel call for the whole sequence; single device sync.
    hid_spk, out_spk, hid_mem, out_mem = fsnn_forward_sequence(
        params, xs, wv, tottime, n_hid, n_out)
    jax.block_until_ready((hid_spk, out_spk, hid_mem, out_mem))

    # Verify against the NumPy reference of the PyTorch semantics.
    pnp = dict(Wh=np.asarray(params["wh_t"]).T, bh=np.asarray(params["bh"])[0],
               Wo=np.asarray(params["wo_t"]).T, bo=np.asarray(params["bo"])[0],
               Ws=np.asarray(params["ws_t"]).T, bs=np.asarray(params["bs"])[0])
    ref = ref_run(pnp, np.asarray(xs), n_hid, n_out, tottime, wv)

    hs = np.asarray(hid_spk)
    osk = np.asarray(out_spk)
    hm = np.asarray(hid_mem)
    om = np.asarray(out_mem)
    for t in range(T):
        rh_spk, rh_mem, ro_spk, ro_mem = ref[t]
        np.testing.assert_allclose(hm[t], rh_mem, rtol=1e-4, atol=1e-2)
        np.testing.assert_allclose(om[t], ro_mem, rtol=1e-4, atol=1e-2)
        np.testing.assert_array_equal(hs[t], rh_spk)
        np.testing.assert_array_equal(osk[t], ro_spk)

    print("KERNEL_OK")
</pallas_src>

<mosaic_0001>
module attributes {stable_mosaic.version = 11 : i64} {
  func.func @_fsnn_seq_kernel(%arg0: memref<6x16xf32, #tpu.memory_space<vmem>>, %arg1: memref<6x8x128xf32, #tpu.memory_space<vmem>>, %arg2: memref<16x128xf32, #tpu.memory_space<vmem>>, %arg3: memref<1x128xf32, #tpu.memory_space<vmem>>, %arg4: memref<128x128xf32, #tpu.memory_space<vmem>>, %arg5: memref<6x128xf32, #tpu.memory_space<vmem>>, %arg6: memref<6x128xf32, #tpu.memory_space<vmem>>, %arg7: memref<8x128xf32, #tpu.memory_space<vmem>>) attributes {dimension_semantics = [], scalar_prefetch = 0 : i64, scratch_operands = 1 : i64, tpu.core_type = #tpu.core_type<tc>} {
    %c0 = arith.constant 0 : index
    %c0_0 = arith.constant 0 : index
    %0 = vector.load %arg0[%c0, %c0_0] : memref<6x16xf32, #tpu.memory_space<vmem>>, vector<6x16xf32>
    %c0_1 = arith.constant 0 : index
    %c0_2 = arith.constant 0 : index
    %1 = vector.load %arg2[%c0_1, %c0_2] : memref<16x128xf32, #tpu.memory_space<vmem>>, vector<16x128xf32>
    %cst = arith.constant dense<0.000000e+00> : vector<6x128xf32>
    %2 = tpu.matmul %0, %1, %cst {dimension_numbers = #tpu.dot_dimension_numbers<[1], [0], [0], [1], [0, 0, 1, 1], [], []>, precision = #tpu.contract_precision<fp32>} : vector<6x16xf32>, vector<16x128xf32>, vector<6x128xf32> -> vector<6x128xf32>
    %c0_3 = arith.constant 0 : index
    %c0_4 = arith.constant 0 : index
    %3 = vector.load %arg3[%c0_3, %c0_4] : memref<1x128xf32, #tpu.memory_space<vmem>>, vector<1x128xf32>
    %4 = vector.broadcast %3 : vector<1x128xf32> to vector<6x128xf32>
    %5 = arith.addf %2, %4 : vector<6x128xf32>
    %c0_5 = arith.constant 0 : index
    %c0_6 = arith.constant 0 : index
    %6 = vector.load %arg4[%c0_5, %c0_6] : memref<128x128xf32, #tpu.memory_space<vmem>>, vector<128x128xf32>
    %cst_7 = arith.constant 0.000000e+00 : f32
    %7 = vector.broadcast %cst_7 : f32 to vector<8x128xf32>
    %c0_8 = arith.constant 0 : index
    %c0_9 = arith.constant 0 : index
    %8 = vector.load %arg7[%c0_8, %c0_9] : memref<8x128xf32, #tpu.memory_space<vmem>>, vector<8x128xf32>
    tpu.vector_store %arg7[%c0_8, %c0_9], %7 {strides = array<i32>} : memref<8x128xf32, #tpu.memory_space<vmem>>, vector<8x128xf32>,
    %cst_10 = arith.constant -7.000000e+01 : f32
    %9 = vector.broadcast %cst_10 : f32 to vector<1x128xf32>
    %cst_11 = arith.constant 0.000000e+00 : f32
    %10 = vector.broadcast %cst_11 : f32 to vector<1x128xf32>
    %c0_12 = arith.constant 0 : index
    %c0_13 = arith.constant 0 : index
    %11 = vector.load %arg5[%c0_12, %c0_13] : memref<6x128xf32, #tpu.memory_space<vmem>>, vector<1x128xf32>
    tpu.vector_store %arg5[%c0_12, %c0_13], %10 {strides = array<i32>} : memref<6x128xf32, #tpu.memory_space<vmem>>, vector<1x128xf32>,
    %c0_14 = arith.constant 0 : index
    %c0_15 = arith.constant 0 : index
    %12 = vector.load %arg6[%c0_14, %c0_15] : memref<6x128xf32, #tpu.memory_space<vmem>>, vector<1x128xf32>
    tpu.vector_store %arg6[%c0_14, %c0_15], %9 {strides = array<i32>} : memref<6x128xf32, #tpu.memory_space<vmem>>, vector<1x128xf32>,
    %cst_16 = arith.constant -5.000000e+01 : f32
    %13 = vector.broadcast %cst_16 : f32 to vector<1x128xf32>
    %14 = arith.subf %9, %13 : vector<1x128xf32>
    %cst_17 = arith.constant 0.000000e+00 : f32
    %15 = vector.broadcast %cst_17 : f32 to vector<1x128xf32>
    %16 = arith.cmpf ogt, %14, %15 : vector<1x128xf32>
    %17 = arith.extui %16 : vector<1x128xi1> to vector<1x128xi32>
    %18 = arith.sitofp %17 : vector<1x128xi32> to vector<1x128xf32>
    %19 = vector.extract_strided_slice %5 {offsets = [1, 0], sizes = [1, 128], strides = [1, 1]} : vector<6x128xf32> to vector<1x128xf32>
    %cst_18 = arith.constant dense<0.000000e+00> : vector<1x128xf32>
    %20 = tpu.matmul %18, %6, %cst_18 {dimension_numbers = #tpu.dot_dimension_numbers<[1], [0], [0], [1], [0, 0, 1, 1], [], []>, precision = #tpu.contract_precision<fp32>} : vector<1x128xf32>, vector<128x128xf32>, vector<1x128xf32> -> vector<1x128xf32>
    %21 = arith.addf %19, %20 : vector<1x128xf32>
    %c1 = arith.constant 1 : index
    %c0_19 = arith.constant 0 : index
    %c0_20 = arith.constant 0 : index
    %22 = vector.load %arg1[%c1, %c0_19, %c0_20] : memref<6x8x128xf32, #tpu.memory_space<vmem>>, vector<1x8x128xf32>
    %23 = vector.shape_cast %22 : vector<1x8x128xf32> to vector<8x128xf32>
    %c0_21 = arith.constant 0 : index
    %c0_22 = arith.constant 0 : index
    %24 = vector.load %arg7[%c0_21, %c0_22] : memref<8x128xf32, #tpu.memory_space<vmem>>, vector<8x128xf32>
    %25 = arith.mulf %23, %24 : vector<8x128xf32>
    %cst_23 = arith.constant dense<0.000000e+00> : vector<128xf32>
    %26 = vector.multi_reduction <add>, %25, %cst_23 [0] : vector<8x128xf32> to vector<128xf32>
    %27 = vector.shape_cast %26 : vector<128xf32> to vector<1x128xf32>
    %cst_24 = arith.constant -7.000000e+01 : f32
    %28 = vector.broadcast %cst_24 : f32 to vector<1x128xf32>
    %29 = arith.subf %28, %9 : vector<1x128xf32>
    %cst_25 = arith.constant 5.000000e-02 : f32
    %30 = vector.broadcast %cst_25 : f32 to vector<1x128xf32>
    %31 = arith.mulf %30, %29 : vector<1x128xf32>
    %32 = arith.addf %9, %31 : vector<1x128xf32>
    %cst_26 = arith.constant 2.000000e+00 : f32
    %33 = vector.broadcast %cst_26 : f32 to vector<1x128xf32>
    %34 = arith.mulf %33, %21 : vector<1x128xf32>
    %35 = arith.addf %32, %34 : vector<1x128xf32>
    %36 = arith.subf %35, %27 : vector<1x128xf32>
    %cst_27 = arith.constant -7.000000e+01 : f32
    %37 = vector.broadcast %cst_27 : f32 to vector<1x128xf32>
    %38 = arith.subf %36, %37 : vector<1x128xf32>
    %39 = arith.mulf %18, %38 : vector<1x128xf32>
    %40 = arith.subf %36, %39 : vector<1x128xf32>
    %41 = arith.subf %40, %9 : vector<1x128xf32>
    %c0_28 = arith.constant 0 : index
    %c0_29 = arith.constant 0 : index
    %42 = vector.load %arg7[%c0_28, %c0_29] : memref<8x128xf32, #tpu.memory_space<vmem>>, vector<1x128xf32>
    tpu.vector_store %arg7[%c0_28, %c0_29], %41 {strides = array<i32>} : memref<8x128xf32, #tpu.memory_space<vmem>>, vector<1x128xf32>,
    %c1_30 = arith.constant 1 : index
    %c0_31 = arith.constant 0 : index
    %43 = vector.load %arg5[%c1_30, %c0_31] : memref<6x128xf32, #tpu.memory_space<vmem>>, vector<1x128xf32>
    tpu.vector_store %arg5[%c1_30, %c0_31], %18 {strides = array<i32>} : memref<6x128xf32, #tpu.memory_space<vmem>>, vector<1x128xf32>,
    %c1_32 = arith.constant 1 : index
    %c0_33 = arith.constant 0 : index
    %44 = vector.load %arg6[%c1_32, %c0_33] : memref<6x128xf32, #tpu.memory_space<vmem>>, vector<1x128xf32>
    tpu.vector_store %arg6[%c1_32, %c0_33], %40 {strides = array<i32>} : memref<6x128xf32, #tpu.memory_space<vmem>>, vector<1x128xf32>,
    %cst_34 = arith.constant -5.000000e+01 : f32
    %45 = vector.broadcast %cst_34 : f32 to vector<1x128xf32>
    %46 = arith.subf %40, %45 : vector<1x128xf32>
    %cst_35 = arith.constant 0.000000e+00 : f32
    %47 = vector.broadcast %cst_35 : f32 to vector<1x128xf32>
    %48 = arith.cmpf ogt, %46, %47 : vector<1x128xf32>
    %49 = arith.extui %48 : vector<1x128xi1> to vector<1x128xi32>
    %50 = arith.sitofp %49 : vector<1x128xi32> to vector<1x128xf32>
    %51 = vector.extract_strided_slice %5 {offsets = [2, 0], sizes = [1, 128], strides = [1, 1]} : vector<6x128xf32> to vector<1x128xf32>
    %cst_36 = arith.constant dense<0.000000e+00> : vector<1x128xf32>
    %52 = tpu.matmul %50, %6, %cst_36 {dimension_numbers = #tpu.dot_dimension_numbers<[1], [0], [0], [1], [0, 0, 1, 1], [], []>, precision = #tpu.contract_precision<fp32>} : vector<1x128xf32>, vector<128x128xf32>, vector<1x128xf32> -> vector<1x128xf32>
    %53 = arith.addf %51, %52 : vector<1x128xf32>
    %c2 = arith.constant 2 : index
    %c0_37 = arith.constant 0 : index
    %c0_38 = arith.constant 0 : index
    %54 = vector.load %arg1[%c2, %c0_37, %c0_38] : memref<6x8x128xf32, #tpu.memory_space<vmem>>, vector<1x8x128xf32>
    %55 = vector.shape_cast %54 : vector<1x8x128xf32> to vector<8x128xf32>
    %c0_39 = arith.constant 0 : index
    %c0_40 = arith.constant 0 : index
    %56 = vector.load %arg7[%c0_39, %c0_40] : memref<8x128xf32, #tpu.memory_space<vmem>>, vector<8x128xf32>
    %57 = arith.mulf %55, %56 : vector<8x128xf32>
    %cst_41 = arith.constant dense<0.000000e+00> : vector<128xf32>
    %58 = vector.multi_reduction <add>, %57, %cst_41 [0] : vector<8x128xf32> to vector<128xf32>
    %59 = vector.shape_cast %58 : vector<128xf32> to vector<1x128xf32>
    %cst_42 = arith.constant -7.000000e+01 : f32
    %60 = vector.broadcast %cst_42 : f32 to vector<1x128xf32>
    %61 = arith.subf %60, %40 : vector<1x128xf32>
    %cst_43 = arith.constant 0.0465691872 : f32
    %62 = vector.broadcast %cst_43 : f32 to vector<1x128xf32>
    %63 = arith.mulf %62, %61 : vector<1x128xf32>
    %64 = arith.addf %40, %63 : vector<1x128xf32>
    %cst_44 = arith.constant 1.86276758 : f32
    %65 = vector.broadcast %cst_44 : f32 to vector<1x128xf32>
    %66 = arith.mulf %65, %53 : vector<1x128xf32>
    %67 = arith.addf %64, %66 : vector<1x128xf32>
    %68 = arith.subf %67, %59 : vector<1x128xf32>
    %cst_45 = arith.constant -7.000000e+01 : f32
    %69 = vector.broadcast %cst_45 : f32 to vector<1x128xf32>
    %70 = arith.subf %68, %69 : vector<1x128xf32>
    %71 = arith.mulf %50, %70 : vector<1x128xf32>
    %72 = arith.subf %68, %71 : vector<1x128xf32>
    %73 = arith.subf %72, %40 : vector<1x128xf32>
    %c1_46 = arith.constant 1 : index
    %c0_47 = arith.constant 0 : index
    %74 = vector.load %arg7[%c1_46, %c0_47] : memref<8x128xf32, #tpu.memory_space<vmem>>, vector<1x128xf32>
    tpu.vector_store %arg7[%c1_46, %c0_47], %73 {strides = array<i32>} : memref<8x128xf32, #tpu.memory_space<vmem>>, vector<1x128xf32>,
    %c2_48 = arith.constant 2 : index
    %c0_49 = arith.constant 0 : index
    %75 = vector.load %arg5[%c2_48, %c0_49] : memref<6x128xf32, #tpu.memory_space<vmem>>, vector<1x128xf32>
    tpu.vector_store %arg5[%c2_48, %c0_49], %50 {strides = array<i32>} : memref<6x128xf32, #tpu.memory_space<vmem>>, vector<1x128xf32>,
    %c2_50 = arith.constant 2 : index
    %c0_51 = arith.constant 0 : index
    %76 = vector.load %arg6[%c2_50, %c0_51] : memref<6x128xf32, #tpu.memory_space<vmem>>, vector<1x128xf32>
    tpu.vector_store %arg6[%c2_50, %c0_51], %72 {strides = array<i32>} : memref<6x128xf32, #tpu.memory_space<vmem>>, vector<1x128xf32>,
    %cst_52 = arith.constant -5.000000e+01 : f32
    %77 = vector.broadcast %cst_52 : f32 to vector<1x128xf32>
    %78 = arith.subf %72, %77 : vector<1x128xf32>
    %cst_53 = arith.constant 0.000000e+00 : f32
    %79 = vector.broadcast %cst_53 : f32 to vector<1x128xf32>
    %80 = arith.cmpf ogt, %78, %79 : vector<1x128xf32>
    %81 = arith.extui %80 : vector<1x128xi1> to vector<1x128xi32>
    %82 = arith.sitofp %81 : vector<1x128xi32> to vector<1x128xf32>
    %83 = vector.extract_strided_slice %5 {offsets = [3, 0], sizes = [1, 128], strides = [1, 1]} : vector<6x128xf32> to vector<1x128xf32>
    %cst_54 = arith.constant dense<0.000000e+00> : vector<1x128xf32>
    %84 = tpu.matmul %82, %6, %cst_54 {dimension_numbers = #tpu.dot_dimension_numbers<[1], [0], [0], [1], [0, 0, 1, 1], [], []>, precision = #tpu.contract_precision<fp32>} : vector<1x128xf32>, vector<128x128xf32>, vector<1x128xf32> -> vector<1x128xf32>
    %85 = arith.addf %83, %84 : vector<1x128xf32>
    %c3 = arith.constant 3 : index
    %c0_55 = arith.constant 0 : index
    %c0_56 = arith.constant 0 : index
    %86 = vector.load %arg1[%c3, %c0_55, %c0_56] : memref<6x8x128xf32, #tpu.memory_space<vmem>>, vector<1x8x128xf32>
    %87 = vector.shape_cast %86 : vector<1x8x128xf32> to vector<8x128xf32>
    %c0_57 = arith.constant 0 : index
    %c0_58 = arith.constant 0 : index
    %88 = vector.load %arg7[%c0_57, %c0_58] : memref<8x128xf32, #tpu.memory_space<vmem>>, vector<8x128xf32>
    %89 = arith.mulf %87, %88 : vector<8x128xf32>
    %cst_59 = arith.constant dense<0.000000e+00> : vector<128xf32>
    %90 = vector.multi_reduction <add>, %89, %cst_59 [0] : vector<8x128xf32> to vector<128xf32>
    %91 = vector.shape_cast %90 : vector<128xf32> to vector<1x128xf32>
    %cst_60 = arith.constant -7.000000e+01 : f32
    %92 = vector.broadcast %cst_60 : f32 to vector<1x128xf32>
    %93 = arith.subf %92, %72 : vector<1x128xf32>
    %cst_61 = arith.constant 0.0465691872 : f32
    %94 = vector.broadcast %cst_61 : f32 to vector<1x128xf32>
    %95 = arith.mulf %94, %93 : vector<1x128xf32>
    %96 = arith.addf %72, %95 : vector<1x128xf32>
    %cst_62 = arith.constant 1.86276758 : f32
    %97 = vector.broadcast %cst_62 : f32 to vector<1x128xf32>
    %98 = arith.mulf %97, %85 : vector<1x128xf32>
    %99 = arith.addf %96, %98 : vector<1x128xf32>
    %100 = arith.subf %99, %91 : vector<1x128xf32>
    %cst_63 = arith.constant -7.000000e+01 : f32
    %101 = vector.broadcast %cst_63 : f32 to vector<1x128xf32>
    %102 = arith.subf %100, %101 : vector<1x128xf32>
    %103 = arith.mulf %82, %102 : vector<1x128xf32>
    %104 = arith.subf %100, %103 : vector<1x128xf32>
    %105 = arith.subf %104, %72 : vector<1x128xf32>
    %c2_64 = arith.constant 2 : index
    %c0_65 = arith.constant 0 : index
    %106 = vector.load %arg7[%c2_64, %c0_65] : memref<8x128xf32, #tpu.memory_space<vmem>>, vector<1x128xf32>
    tpu.vector_store %arg7[%c2_64, %c0_65], %105 {strides = array<i32>} : memref<8x128xf32, #tpu.memory_space<vmem>>, vector<1x128xf32>,
    %c3_66 = arith.constant 3 : index
    %c0_67 = arith.constant 0 : index
    %107 = vector.load %arg5[%c3_66, %c0_67] : memref<6x128xf32, #tpu.memory_space<vmem>>, vector<1x128xf32>
    tpu.vector_store %arg5[%c3_66, %c0_67], %82 {strides = array<i32>} : memref<6x128xf32, #tpu.memory_space<vmem>>, vector<1x128xf32>,
    %c3_68 = arith.constant 3 : index
    %c0_69 = arith.constant 0 : index
    %108 = vector.load %arg6[%c3_68, %c0_69] : memref<6x128xf32, #tpu.memory_space<vmem>>, vector<1x128xf32>
    tpu.vector_store %arg6[%c3_68, %c0_69], %104 {strides = array<i32>} : memref<6x128xf32, #tpu.memory_space<vmem>>, vector<1x128xf32>,
    %cst_70 = arith.constant -5.000000e+01 : f32
    %109 = vector.broadcast %cst_70 : f32 to vector<1x128xf32>
    %110 = arith.subf %104, %109 : vector<1x128xf32>
    %cst_71 = arith.constant 0.000000e+00 : f32
    %111 = vector.broadcast %cst_71 : f32 to vector<1x128xf32>
    %112 = arith.cmpf ogt, %110, %111 : vector<1x128xf32>
    %113 = arith.extui %112 : vector<1x128xi1> to vector<1x128xi32>
    %114 = arith.sitofp %113 : vector<1x128xi32> to vector<1x128xf32>
    %115 = vector.extract_strided_slice %5 {offsets = [4, 0], sizes = [1, 128], strides = [1, 1]} : vector<6x128xf32> to vector<1x128xf32>
    %cst_72 = arith.constant dense<0.000000e+00> : vector<1x128xf32>
    %116 = tpu.matmul %114, %6, %cst_72 {dimension_numbers = #tpu.dot_dimension_numbers<[1], [0], [0], [1], [0, 0, 1, 1], [], []>, precision = #tpu.contract_precision<fp32>} : vector<1x128xf32>, vector<128x128xf32>, vector<1x128xf32> -> vector<1x128xf32>
    %117 = arith.addf %115, %116 : vector<1x128xf32>
    %c4 = arith.constant 4 : index
    %c0_73 = arith.constant 0 : index
    %c0_74 = arith.constant 0 : index
    %118 = vector.load %arg1[%c4, %c0_73, %c0_74] : memref<6x8x128xf32, #tpu.memory_space<vmem>>, vector<1x8x128xf32>
    %119 = vector.shape_cast %118 : vector<1x8x128xf32> to vector<8x128xf32>
    %c0_75 = arith.constant 0 : index
    %c0_76 = arith.constant 0 : index
    %120 = vector.load %arg7[%c0_75, %c0_76] : memref<8x128xf32, #tpu.memory_space<vmem>>, vector<8x128xf32>
    %121 = arith.mulf %119, %120 : vector<8x128xf32>
    %cst_77 = arith.constant dense<0.000000e+00> : vector<128xf32>
    %122 = vector.multi_reduction <add>, %121, %cst_77 [0] : vector<8x128xf32> to vector<128xf32>
    %123 = vector.shape_cast %122 : vector<128xf32> to vector<1x128xf32>
    %cst_78 = arith.constant -7.000000e+01 : f32
    %124 = vector.broadcast %cst_78 : f32 to vector<1x128xf32>
    %125 = arith.subf %124, %104 : vector<1x128xf32>
    %cst_79 = arith.constant 0.0465691872 : f32
    %126 = vector.broadcast %cst_79 : f32 to vector<1x128xf32>
    %127 = arith.mulf %126, %125 : vector<1x128xf32>
    %128 = arith.addf %104, %127 : vector<1x128xf32>
    %cst_80 = arith.constant 1.86276758 : f32
    %129 = vector.broadcast %cst_80 : f32 to vector<1x128xf32>
    %130 = arith.mulf %129, %117 : vector<1x128xf32>
    %131 = arith.addf %128, %130 : vector<1x128xf32>
    %132 = arith.subf %131, %123 : vector<1x128xf32>
    %cst_81 = arith.constant -7.000000e+01 : f32
    %133 = vector.broadcast %cst_81 : f32 to vector<1x128xf32>
    %134 = arith.subf %132, %133 : vector<1x128xf32>
    %135 = arith.mulf %114, %134 : vector<1x128xf32>
    %136 = arith.subf %132, %135 : vector<1x128xf32>
    %137 = arith.subf %136, %104 : vector<1x128xf32>
    %c3_82 = arith.constant 3 : index
    %c0_83 = arith.constant 0 : index
    %138 = vector.load %arg7[%c3_82, %c0_83] : memref<8x128xf32, #tpu.memory_space<vmem>>, vector<1x128xf32>
    tpu.vector_store %arg7[%c3_82, %c0_83], %137 {strides = array<i32>} : memref<8x128xf32, #tpu.memory_space<vmem>>, vector<1x128xf32>,
    %c4_84 = arith.constant 4 : index
    %c0_85 = arith.constant 0 : index
    %139 = vector.load %arg5[%c4_84, %c0_85] : memref<6x128xf32, #tpu.memory_space<vmem>>, vector<1x128xf32>
    tpu.vector_store %arg5[%c4_84, %c0_85], %114 {strides = array<i32>} : memref<6x128xf32, #tpu.memory_space<vmem>>, vector<1x128xf32>,
    %c4_86 = arith.constant 4 : index
    %c0_87 = arith.constant 0 : index
    %140 = vector.load %arg6[%c4_86, %c0_87] : memref<6x128xf32, #tpu.memory_space<vmem>>, vector<1x128xf32>
    tpu.vector_store %arg6[%c4_86, %c0_87], %136 {strides = array<i32>} : memref<6x128xf32, #tpu.memory_space<vmem>>, vector<1x128xf32>,
    %cst_88 = arith.constant -5.000000e+01 : f32
    %141 = vector.broadcast %cst_88 : f32 to vector<1x128xf32>
    %142 = arith.subf %136, %141 : vector<1x128xf32>
    %cst_89 = arith.constant 0.000000e+00 : f32
    %143 = vector.broadcast %cst_89 : f32 to vector<1x128xf32>
    %144 = arith.cmpf ogt, %142, %143 : vector<1x128xf32>
    %145 = arith.extui %144 : vector<1x128xi1> to vector<1x128xi32>
    %146 = arith.sitofp %145 : vector<1x128xi32> to vector<1x128xf32>
    %147 = vector.extract_strided_slice %5 {offsets = [5, 0], sizes = [1, 128], strides = [1, 1]} : vector<6x128xf32> to vector<1x128xf32>
    %cst_90 = arith.constant dense<0.000000e+00> : vector<1x128xf32>
    %148 = tpu.matmul %146, %6, %cst_90 {dimension_numbers = #tpu.dot_dimension_numbers<[1], [0], [0], [1], [0, 0, 1, 1], [], []>, precision = #tpu.contract_precision<fp32>} : vector<1x128xf32>, vector<128x128xf32>, vector<1x128xf32> -> vector<1x128xf32>
    %149 = arith.addf %147, %148 : vector<1x128xf32>
    %c5 = arith.constant 5 : index
    %c0_91 = arith.constant 0 : index
    %c0_92 = arith.constant 0 : index
    %150 = vector.load %arg1[%c5, %c0_91, %c0_92] : memref<6x8x128xf32, #tpu.memory_space<vmem>>, vector<1x8x128xf32>
    %151 = vector.shape_cast %150 : vector<1x8x128xf32> to vector<8x128xf32>
    %c0_93 = arith.constant 0 : index
    %c0_94 = arith.constant 0 : index
    %152 = vector.load %arg7[%c0_93, %c0_94] : memref<8x128xf32, #tpu.memory_space<vmem>>, vector<8x128xf32>
    %153 = arith.mulf %151, %152 : vector<8x128xf32>
    %cst_95 = arith.constant dense<0.000000e+00> : vector<128xf32>
    %154 = vector.multi_reduction <add>, %153, %cst_95 [0] : vector<8x128xf32> to vector<128xf32>
    %155 = vector.shape_cast %154 : vector<128xf32> to vector<1x128xf32>
    %cst_96 = arith.constant -7.000000e+01 : f32
    %156 = vector.broadcast %cst_96 : f32 to vector<1x128xf32>
    %157 = arith.subf %156, %136 : vector<1x128xf32>
    %cst_97 = arith.constant 0.0465691872 : f32
    %158 = vector.broadcast %cst_97 : f32 to vector<1x128xf32>
    %159 = arith.mulf %158, %157 : vector<1x128xf32>
    %160 = arith.addf %136, %159 : vector<1x128xf32>
    %cst_98 = arith.constant 1.86276758 : f32
    %161 = vector.broadcast %cst_98 : f32 to vector<1x128xf32>
    %162 = arith.mulf %161, %149 : vector<1x128xf32>
    %163 = arith.addf %160, %162 : vector<1x128xf32>
    %164 = arith.subf %163, %155 : vector<1x128xf32>
    %cst_99 = arith.constant -7.000000e+01 : f32
    %165 = vector.broadcast %cst_99 : f32 to vector<1x128xf32>
    %166 = arith.subf %164, %165 : vector<1x128xf32>
    %167 = arith.mulf %146, %166 : vector<1x128xf32>
    %168 = arith.subf %164, %167 : vector<1x128xf32>
    %169 = arith.subf %168, %136 : vector<1x128xf32>
    %c4_100 = arith.constant 4 : index
    %c0_101 = arith.constant 0 : index
    %170 = vector.load %arg7[%c4_100, %c0_101] : memref<8x128xf32, #tpu.memory_space<vmem>>, vector<1x128xf32>
    tpu.vector_store %arg7[%c4_100, %c0_101], %169 {strides = array<i32>} : memref<8x128xf32, #tpu.memory_space<vmem>>, vector<1x128xf32>,
    %c5_102 = arith.constant 5 : index
    %c0_103 = arith.constant 0 : index
    %171 = vector.load %arg5[%c5_102, %c0_103] : memref<6x128xf32, #tpu.memory_space<vmem>>, vector<1x128xf32>
    tpu.vector_store %arg5[%c5_102, %c0_103], %146 {strides = array<i32>} : memref<6x128xf32, #tpu.memory_space<vmem>>, vector<1x128xf32>,
    %c5_104 = arith.constant 5 : index
    %c0_105 = arith.constant 0 : index
    %172 = vector.load %arg6[%c5_104, %c0_105] : memref<6x128xf32, #tpu.memory_space<vmem>>, vector<1x128xf32>
    tpu.vector_store %arg6[%c5_104, %c0_105], %168 {strides = array<i32>} : memref<6x128xf32, #tpu.memory_space<vmem>>, vector<1x128xf32>,
    return
  }
}

</mosaic_0001>

<bundles_post_ra>
// kernel: tpu_custom_call.1
= control target key start
LH: loop header
LB: loop body
LE: loop exit
PB: predicated region body
PF: predicated region fallthrough
CT: control target
= control target key end

     0   :  { %12 = vsyncpa [#allocation4], 0  ;;  %s3211_s0 = inlined_call_operand.hbm [shape: f32[6,16], index: 0, kind: input, shape index: {}]   ;;  %s3212_s1 = inlined_call_operand.hbm [shape: f32[6,8,128], index: 1, kind: input, shape index: {}]   ;;  %s3213_s2 = inlined_call_operand.hbm [shape: f32[16,128], index: 2, kind: input, shape index: {}]   ;;  %s3214_s3 = inlined_call_operand.vmem [shape: f32[1,128], index: 3, kind: input, shape index: {}]   ;;  %s3215_s4 = inlined_call_operand.hbm [shape: f32[128,128], index: 4, kind: input, shape index: {}]   ;;  %s3216_s5 = inlined_call_operand.hbm [shape: f32[6,128], index: 5, kind: output, shape index: {0}]   ;;  %s3217_s6 = inlined_call_operand.hbm [shape: f32[6,128], index: 6, kind: output, shape index: {1}]  }
   0x1   :  { %13 = vsyncpa [#allocation7], 0 }
   0x2   :  { %14 = vsyncpa [#allocation10], 0 }
   0x3   :  { %15 = vsyncpa [#allocation5], 0  ;;  %s32_s23 = sshll.u32 %s3212_s1, 4  ;;  %s33_s23 = int_to_ptr.hbm [resolvable:$true] %s32_s23 }
   0x4   :  { %16 = vsyncpa [#allocation13], 0  ;;  %s2368_s24 = smov [#allocation6]   ;;  %s22_s28 = sshll.u32 %s3211_s0, 4  ;;  %s23_s28 = int_to_ptr.hbm [resolvable:$true] %s22_s28 }
   0x5   :  { %s34_s25 = sshll.u32 %s2368_s24, 4  ;;  %s2369_s29 = smov 128   ;;  %s35_s25 = int_to_ptr.vmem [resolvable:$true] %s34_s25 }
   0x6   :  { %s2370_s30 = smov 8   ;;  %s2371_s7 = smov [#allocation3]  }
   0x7   :  { %40 = dma.hbm_to_vmem [thread:$0]  %s33_s23, 768, %s35_s25, [#allocation7], %s2369_s29, %s2369_s29, %s2370_s30  }
   0x8   :  { %s24_s8 = sshll.u32 %s2371_s7, 4  ;;  %s45_s11 = sshll.u32 %s3213_s2, 4  ;;  %s25_s8 = int_to_ptr.vmem [resolvable:$true] %s24_s8  ;;  %s46_s11 = int_to_ptr.hbm [resolvable:$true] %s45_s11 }
   0x9   :  { %27 = dma.hbm_to_vmem [thread:$0]  %s23_s28, 128, %s25_s8, [#allocation4]  }
   0xa   :  { %s60_s13 = sshll.u32 %s3215_s4, 4  ;;  %s2372_s14 = smov [#allocation8]   ;;  %s61_s13 = int_to_ptr.hbm [resolvable:$true] %s60_s13 }
   0xb   :  { %s47_s15 = sshll.u32 %s2372_s14, 4  ;;  %s2373_s0 = smov [#allocation9]   ;;  %s48_s15 = int_to_ptr.vmem [resolvable:$true] %s47_s15 }
   0xc   :  { %53 = dma.hbm_to_vmem [thread:$0]  %s46_s11, 256, %s48_s15, [#allocation7], %s2369_s29, %s2369_s29, %s2370_s30  }
   0xd   :  { %s62_s16 = sshll.u32 %s2373_s0, 4  ;;  %s63_s16 = int_to_ptr.vmem [resolvable:$true] %s62_s16 }
   0xe   :  { %68 = dma.hbm_to_vmem [thread:$0]  %s61_s13, 2048, %s63_s16, [#allocation10], %s2369_s29, %s2369_s29, %s2370_s30  }
   0xf   :  { %2358 = dma.done.wait [#allocation4], 128  }
  0x10   :  { %2359 = vsyncadd [#allocation4], 4294967168 }
  0x11   :  { %2360 = dma.done.wait [#allocation7], 1024  }
  0x12   :  { %2361 = vsyncadd [#allocation7], 4294966272 }
  0x13   :  { %2362 = dma.done.wait [#allocation10], 2048  }
  0x14   :  { %2363 = vsyncadd [#allocation10], 4294965248  ;;  %v270_v0 = vld [vmem:[#allocation9 + $0x78] sm:$0xff]  ;;  %v269_v1 = vld [vmem:[#allocation9 + $0x70] sm:$0xff]  ;;  %vm92_vm0 = vcmask 130048   ;;  %s2161_s20 = sshll.u32 %s3216_s5, 4  ;;  %s2162_s20 = int_to_ptr.hbm [resolvable:$true] %s2161_s20 }
  0x15   :  { %v268_v2 = vld [vmem:[#allocation9 + $0x68] sm:$0xff]  ;;  %v2425_v3 = vand.u32 4294901760, %v270_v0  ;;  %v2427_v4 = vand.u32 4294901760, %v269_v1  ;;  %v267_v6 = vld [vmem:[#allocation9 + $0x60] sm:$0xff]  ;;  %v266_v7 = vld [vmem:[#allocation9 + $0x58] sm:$0xff]  ;;  %s2377_s5 = smov [#allocation12]  }
  0x16   :  { %v2429_v5 = vand.u32 4294901760, %v268_v2  ;;  %v265_v8 = vld [vmem:[#allocation9 + $0x50] sm:$0xff]  ;;  %v2431_v9 = vand.u32 4294901760, %v267_v6  ;;  %v2433_v10 = vand.u32 4294901760, %v266_v7  ;;  %v264_v12 = vld [vmem:[#allocation9 + $0x48] sm:$0xff]  ;;  %v87_v13 = vld [vmem:[#allocation8 + $0x8] sm:$0xff] }
  0x17   :  { %v2435_v11 = vand.u32 4294901760, %v265_v8  ;;  %278 = vmatpush.msra.mxu2 %v2425_v3  ;;  %v2439_v14 = vsub.f32 %v270_v0, %v2425_v3  ;;  %v2442_v15 = vsub.f32 %v269_v1, %v2427_v4  ;;  %v263_v17 = vld [vmem:[#allocation9 + $0x40] sm:$0xff]  ;;  %v2450_v19 = vand.u32 4294901760, %v264_v12  ;;  %v86_v22 = vld [vmem:[#allocation8] sm:$0xff]  ;;  %v262_v31 = vld [vmem:[#allocation9 + $0x38] sm:$0xff]  ;;  %s2170_s21 = sshll.u32 %s2377_s5, 4  ;;  %s2171_s21 = int_to_ptr.vmem [resolvable:$true] %s2170_s21 }
  0x18   :  { %v2445_v16 = vsub.f32 %v268_v2, %v2429_v5  ;;  %v2448_v18 = vsub.f32 %v267_v6, %v2431_v9  ;;  %v2453_v20 = vsub.f32 %v266_v7, %v2433_v10  ;;  %v2468_v26 = vand.u32 4294901760, %v87_v13  ;;  %v261_v38 = vld [vmem:[#allocation9 + $0x30] sm:$0xff]  ;;  %v85_v39 = vld [vmem:[#allocation3] sm:$0x3f]  ;;  %v260_v44 = vld [vmem:[#allocation9 + $0x28] sm:$0xff]  ;;  %s2172_s24 = sshll.u32 %s3217_s6, 4  ;;  %s2173_s24 = int_to_ptr.hbm [resolvable:$true] %s2172_s24 }
  0x19   :  { %v2456_v21 = vsub.f32 %v265_v8, %v2435_v11  ;;  %280 = vmatpush.msra.mxu2 %v2427_v4  ;;  %v2460_v23 = vand.u32 4294901760, %v2439_v14  ;;  %v2463_v24 = vand.u32 4294901760, %v2442_v15  ;;  %v2476_v29 = vand.u32 4294901760, %v263_v17  ;;  %v259_v49 = vld [vmem:[#allocation9 + $0x20] sm:$0xff]  ;;  %v258_v58 = vld [vmem:[#allocation9 + $0x18] sm:$0xff]  ;;  %v257_v6 = vld [vmem:[#allocation9 + $0x10] sm:$0xff] }
  0x1a   :  { %v2466_v25 = vand.u32 4294901760, %v2445_v16  ;;  %v2471_v27 = vand.u32 4294901760, %v2448_v18  ;;  %v2474_v28 = vand.u32 4294901760, %v2453_v20  ;;  %111 = vmatpush.msra.mxu0 %v2468_v26  ;;  %v2489_v35 = vand.u32 4294901760, %v86_v22 }
  0x1b   :  { %v2479_v30 = vand.u32 4294901760, %v2456_v21  ;;  %282 = vmatpush.msra.mxu2 %v2429_v5  ;;  %v321_v32 = vsub.f32 %v2439_v14, %v2460_v23  ;;  %v327_v33 = vsub.f32 %v2442_v15, %v2463_v24  ;;  %v2494_v37 = vsub.f32 %v264_v12, %v2450_v19 }
  0x1c   :  { %v333_v34 = vsub.f32 %v2445_v16, %v2466_v25  ;;  %v339_v36 = vsub.f32 %v2448_v18, %v2471_v27  ;;  %v2501_v42 = vand.u32 4294901760, %v262_v31  ;;  %113 = vmatpush.msra.mxu0 %v2489_v35  ;;  %v2505_v43 = vsub.f32 %v87_v13, %v2468_v26 }
  0x1d   :  { %v2496_v40 = vand.u32 4294901760, %v321_v32  ;;  %284 = vmatpush.msra.mxu2 %v2431_v9  ;;  %v2499_v41 = vand.u32 4294901760, %v327_v33  ;;  %v345_v46 = vsub.f32 %v2453_v20, %v2474_v28  ;;  %v351_v47 = vsub.f32 %v2456_v21, %v2479_v30  ;;  %v256_v33 = vld [vmem:[#allocation9 + $0x8] sm:$0xff] }
  0x1e   :  { %v2507_v45 = vand.u32 4294901760, %v333_v34  ;;  %v2514_v48 = vand.u32 4294901760, %v2494_v37  ;;  %v3218_v50 = vand.u32 4294901760, %v2505_v43  ;;  %v2519_v51 = vand.u32 4294901760, %v261_v38  ;;  %170 = vmatpush.msrb.mxu0 %v2505_v43 }
  0x1f   :  { %3284 = vst [vmem:[#allocation19_spill] sm:$0xff] %v2496_v40  ;;  %323 = vmatpush.msra.mxu3 %v2496_v40  ;;  %286 = vmatpush.msra.mxu2 %v2433_v10  ;;  %v2522_v52 = vsub.f32 %v263_v17, %v2476_v29  ;;  %v94_v53 = vsel %vm92_vm0, %v85_v39, 0  ;;  %v2525_v54 = vand.u32 4294901760, %v339_v36  ;;  %v2530_v56 = vsub.f32 %v86_v22, %v2489_v35 }
  0x20   :  { %3285 = vst [vmem:[#allocation20_spill] sm:$0xff] %v2499_v41  ;;  %v2527_v55 = vand.u32 4294901760, %v94_v53  ;;  %v2532_v57 = vand.u32 4294901760, %v260_v44  ;;  %v140_v59 = vsub.f32 %v2505_v43, %v3218_v50  ;;  %v2544_v61 = vsub.f32 %v262_v31, %v2501_v42 }
  0x21   :  { %3286 = vst [vmem:[#allocation21_spill] sm:$0xff] %v2507_v45  ;;  %329 = vmatpush.msra.mxu3 %v2499_v41  ;;  %288 = vmatpush.msra.mxu2 %v2435_v11  ;;  %v2541_v60 = vand.u32 4294901760, %v2522_v52  ;;  %v2546_v62 = vand.u32 4294901760, %v259_v49  ;;  %v357_v63 = vsub.f32 %v2494_v37, %v2514_v48  ;;  %v145_v1 = vand.u32 4294901760, %v2530_v56 }
  0x22   :  { %3287 = vst [vmem:[#allocation22_spill] sm:$0xff] %v2525_v54  ;;  %v2551_v0 = vsub.f32 %v94_v53, %v2527_v55  ;;  %v2555_v2 = vsub.f32 %v261_v38, %v2519_v51  ;;  %173 = vmatpush.msrb.mxu0 %v2530_v56  ;;  %v2560_v7 = vand.u32 4294901760, %v345_v46  ;;  %v141_v8 = vand.u32 4294901760, %v140_v59 }
  0x23   :  { %335 = vmatpush.msra.mxu3 %v2507_v45  ;;  %290 = vmatpush.msra.mxu2 %v2450_v19  ;;  %v2563_v12 = vand.u32 4294901760, %v2544_v61  ;;  %v2565_v13 = vand.u32 4294901760, %v258_v58  ;;  %v363_v17 = vsub.f32 %v2522_v52, %v2541_v60  ;;  %v146_v31 = vsub.f32 %v2530_v56, %v145_v1  ;;  %v255_v56 = vld [vmem:[#allocation9] sm:$0xff] }
  0x24   :  { %3288 = vst [vmem:[#allocation23_spill] sm:$0xff] %v2560_v7  ;;  %v116_v22 = vand.u32 4294901760, %v2551_v0  ;;  %v2572_v32 = vsub.f32 %v260_v44, %v2532_v57  ;;  %v2576_v34 = vand.u32 4294901760, %v351_v47  ;;  %v2579_v36 = vand.u32 4294901760, %v2555_v2  ;;  %142 = vmatpush.msra.mxu1 %v141_v8 }
  0x25   :  { %341 = vmatpush.msra.mxu3 %v2525_v54  ;;  %292 = vmatpush.msra.mxu2 %v2476_v29  ;;  %v2581_v38 = vand.u32 4294901760, %v257_v6  ;;  %v2584_v39 = vsub.f32 %v259_v49, %v2546_v62  ;;  %v2586_v46 = vand.u32 4294901760, %v357_v63  ;;  %v147_v53 = vand.u32 4294901760, %v146_v31 }
  0x26   :  { %3289 = vst [vmem:[#allocation24_spill] sm:$0xff] %v2576_v34  ;;  %v117_v44 = vsub.f32 %v2551_v0, %v116_v22  ;;  %v369_v47 = vsub.f32 %v2544_v61, %v2563_v12  ;;  %v2594_v59 = vand.u32 4294901760, %v2572_v32  ;;  %v2596_v50 = vand.u32 4294901760, %v256_v33 }
  0x27   :  { %3290 = vst [vmem:[#allocation25_spill] sm:$0xff] %v2584_v39  ;;  %347 = vmatpush.msra.mxu3 %v2560_v7  ;;  %294 = vmatpush.msra.mxu2 %v2501_v42  ;;  %v2599_v49 = vsub.f32 %v258_v58, %v2565_v13  ;;  %v2601_v63 = vand.u32 4294901760, %v363_v17  ;;  %v375_v31 = vsub.f32 %v2555_v2, %v2579_v36  ;;  %v2608_v7 = vand.u32 4294901760, %v2584_v39 }
  0x28   :  { %3291 = vst [vmem:[#allocation26_spill] sm:$0xff] %v2586_v46  ;;  %v118_v8 = vand.u32 4294901760, %v117_v44  ;;  %148 = vmatpush.msra.mxu1 %v147_v53  ;;  %v2610_v54 = vand.u32 4294901760, %v255_v56  ;;  %v2613_v45 = vsub.f32 %v257_v6, %v2581_v38  ;;  %v2618_v58 = vand.u32 4294901760, %v369_v47 }
  0x29   :  { %3292 = vst [vmem:[#allocation27_spill] sm:$0xff] %v2596_v50  ;;  %353 = vmatpush.msra.mxu3 %v2576_v34  ;;  %296 = vmatpush.msra.mxu2 %v2519_v51  ;;  %v381_v17 = vsub.f32 %v2572_v32, %v2594_v59  ;;  %v2623_v44 = vand.u32 4294901760, %v2599_v49  ;;  %v2626_v53 = vsub.f32 %v256_v33, %v2596_v50  ;;  %v3301_v6 = vand.u32 4294901760, %v2505_v43 }
  0x2a   :  { %3293 = vst [vmem:[#allocation28_spill] sm:$0xff] %v2599_v49  ;;  %119 = vmatmul.f32.vlgmr.msra.gmra.mxu0 %v118_v8  ;;  %150 = vmatmul.f32.vlgmr.msra.gmra.mxu1 %v2527_v55  ;;  %v2633_v47 = vand.u32 4294901760, %v375_v31  ;;  %v387_v8 = vsub.f32 %v2584_v39, %v2608_v7  ;;  %v2641_v33 = vsub.f32 %v255_v56, %v2610_v54 }
  0x2b   :  { %3294 = vst [vmem:[#allocation29_spill] sm:$0xff] %v2601_v63  ;;  %359 = vmatpush.msra.mxu3 %v2586_v46  ;;  %298 = vmatpush.msra.mxu2 %v2532_v57  ;;  %v2638_v46 = vand.u32 4294901760, %v2613_v45  ;;  %v2646_v43 = vand.u32 4294901760, %v381_v17  ;;  %v393_v31 = vsub.f32 %v2599_v49, %v2623_v44 }
  0x2c   :  { %3295 = vst [vmem:[#allocation30_spill] sm:$0xff] %v2608_v7  ;;  %195 = vmatpush.msrb.mxu1 %v2468_v26  ;;  %222 = vmatpush.msra.mxu0 %v3301_v6  ;;  %v2651_v6 = vand.u32 4294901760, %v2626_v53  ;;  %v2656_v56 = vand.u32 4294901760, %v387_v8  ;;  %v2661_v17 = vand.u32 4294901760, %v2641_v33 }
  0x2d   :  { %3296 = vst [vmem:[#allocation31_spill] sm:$0xff] %v2610_v54  ;;  %365 = vmatpush.msra.mxu3 %v2601_v63  ;;  %300 = vmatpush.msra.mxu2 %v2546_v62 }
  0x2e   :  { %3297 = vst [vmem:[#allocation32_spill] sm:$0xff] %v2613_v45  ;;  %197 = vmatpush.msrb.mxu1 %v2489_v35  ;;  %226 = vmatpush.msra.mxu0 %v145_v1  ;;  %v399_v1 = vsub.f32 %v2613_v45, %v2638_v46  ;;  %v405_v8 = vsub.f32 %v2626_v53, %v2651_v6 }
  0x2f   :  { %3298 = vst [vmem:[#allocation33_spill] sm:$0xff] %v2618_v58  ;;  %371 = vmatpush.msra.mxu3 %v2618_v58  ;;  %302 = vmatpush.msra.mxu2 %v2565_v13  ;;  %v3229_v58 = vmov 0.0  }
  0x30   :  { %3299 = vst [vmem:[#allocation34_spill] sm:$0xff] %v2623_v44  ;;  %247 = vmatpush.msra.mxu1 %v2468_v26  ;;  %v2668_v26 = vand.u32 4294901760, %v393_v31  ;;  %v2684_v31 = vand.u32 4294901760, %v405_v8  ;;  %v3315_v8 = vld [vmem:[#allocation23_spill] sm:$0xff] }
  0x31   :  { %3300 = vst [vmem:[#allocation35_spill] sm:$0xff] %v2626_v53  ;;  %377 = vmatpush.msra.mxu3 %v2633_v47  ;;  %304 = vmatpush.msra.mxu2 %v2581_v38 }
  0x32   :  { %3302 = vst [vmem:[#allocation36_spill] sm:$0xff] %v2633_v47  ;;  %176 = vmatmul.f32.vlgmr.msrb.gmra.mxu0 %v2551_v0  ;;  %201 = vmatmul.f32.vlgmr.msrb.gmra.mxu1 %v116_v22  ;;  %v2677_v0 = vand.u32 4294901760, %v399_v1  ;;  %v411_v22 = vsub.f32 %v2641_v33, %v2661_v17  ;;  %v3314_v1 = vld [vmem:[#allocation22_spill] sm:$0xff] }
  0x33   :  { %3303 = vst [vmem:[#allocation37_spill] sm:$0xff] %v2638_v46  ;;  %383 = vmatpush.msra.mxu3 %v2646_v43  ;;  %306 = vmatpush.msra.mxu2 %v2596_v50 }
  0x34   :  { %3304 = vst [vmem:[#allocation38_spill] sm:$0xff] %v2641_v33  ;;  %421 = vmatpush.msrb.mxu0 %v2439_v14  ;;  %249 = vmatpush.msra.mxu1 %v2489_v35  ;;  %v2690_v35 = vand.u32 4294901760, %v411_v22  ;;  %v3316_v22 = vld [vmem:[#allocation26_spill] sm:$0xff] }
  0x35   :  { %3305 = vst [vmem:[#allocation39_spill] sm:$0xff] %v2646_v43  ;;  %389 = vmatpush.msra.mxu3 %v2656_v56  ;;  %308 = vmatpush.msra.mxu2 %v2610_v54 }
  0x36   :  { %3306 = vst [vmem:[#allocation40_spill] sm:$0xff] %v2651_v6  ;;  %424 = vmatpush.msrb.mxu0 %v2442_v15  ;;  %474 = vmatpush.msrb.mxu1 %v2425_v3 }
  0x37   :  { %3307 = vst [vmem:[#allocation41_spill] sm:$0xff] %v2656_v56  ;;  %515 = vmatpush.msrb.mxu2 %v2460_v23  ;;  %395 = vmatpush.msra.mxu3 %v2668_v26 }
  0x38   :  { %3308 = vst [vmem:[#allocation42_spill] sm:$0xff] %v2661_v17  ;;  %427 = vmatpush.msrb.mxu0 %v2445_v16  ;;  %476 = vmatpush.msrb.mxu1 %v2427_v4 }
  0x39   :  { %271 = vst [vmem:[#allocation2] sm:$0xff] %v3229_v58  ;;  %519 = vmatpush.msrb.mxu2 %v2463_v24  ;;  %401 = vmatpush.msra.mxu3 %v2677_v0 }
  0x3a   :  { %272 = vst [vmem:[#allocation11] sm:$0x1] %v3229_v58  ;;  %228 = vmatmul.f32.vlgmr.msra.gmra.mxu0 %v2527_v55  ;;  %251 = vmatmul.f32.vlgmr.msra.gmra.mxu1 %v2527_v55  ;;  %v3313_v55 = vld [vmem:[#allocation21_spill] sm:$0xff] }
  0x3b   :  { %3309 = vst [vmem:[#allocation43_spill] sm:$0xff] %v2668_v26  ;;  %523 = vmatpush.msrb.mxu2 %v2466_v25  ;;  %407 = vmatpush.msra.mxu3 %v2684_v31 }
  0x3c   :  { %640 = vst [vmem:[#allocation11 + $0x1] sm:$0x1] %v3229_v58  ;;  %430 = vmatpush.msrb.mxu0 %v2448_v18  ;;  %478 = vmatpush.msrb.mxu1 %v2429_v5 }
  0x3d   :  { %3310 = vst [vmem:[#allocation44_spill] sm:$0xff] %v2677_v0  ;;  %527 = vmatpush.msrb.mxu2 %v2471_v27  ;;  %413 = vmatpush.msra.mxu3 %v2690_v35 }
  0x3e   :  { %3311 = vst [vmem:[#allocation45_spill] sm:$0xff] %v2684_v31  ;;  %433 = vmatpush.msrb.mxu0 %v2453_v20  ;;  %480 = vmatpush.msrb.mxu1 %v2431_v9 }
  0x3f   :  { %3312 = vst [vmem:[#allocation46_spill] sm:$0xff] %v2690_v35  ;;  %582 = vmatpush.msrb.mxu3 %v2425_v3  ;;  %531 = vmatpush.msrb.mxu2 %v2474_v28 }
  0x40   :  { %436 = vmatpush.msrb.mxu0 %v2456_v21  ;;  %482 = vmatpush.msrb.mxu1 %v2433_v10 }
  0x41   :  { %584 = vmatpush.msrb.mxu3 %v2427_v4  ;;  %535 = vmatpush.msrb.mxu2 %v2479_v30 }
  0x42   :  { %439 = vmatpush.msrb.mxu0 %v2494_v37  ;;  %484 = vmatpush.msrb.mxu1 %v2435_v11 }
  0x43   :  { %586 = vmatpush.msrb.mxu3 %v2429_v5  ;;  %539 = vmatpush.msrb.mxu2 %v2514_v48 }
  0x44   :  { %442 = vmatpush.msrb.mxu0 %v2522_v52  ;;  %486 = vmatpush.msrb.mxu1 %v2450_v19 }
  0x45   :  { %588 = vmatpush.msrb.mxu3 %v2431_v9  ;;  %543 = vmatpush.msrb.mxu2 %v2541_v60 }
  0x46   :  { %445 = vmatpush.msrb.mxu0 %v2544_v61  ;;  %488 = vmatpush.msrb.mxu1 %v2476_v29 }
  0x47   :  { %590 = vmatpush.msrb.mxu3 %v2433_v10  ;;  %547 = vmatpush.msrb.mxu2 %v2563_v12 }
  0x48   :  { %448 = vmatpush.msrb.mxu0 %v2555_v2  ;;  %490 = vmatpush.msrb.mxu1 %v2501_v42 }
  0x49   :  { %592 = vmatpush.msrb.mxu3 %v2435_v11  ;;  %551 = vmatpush.msrb.mxu2 %v2579_v36 }
  0x4a   :  { %451 = vmatpush.msrb.mxu0 %v2572_v32  ;;  %492 = vmatpush.msrb.mxu1 %v2519_v51 }
  0x4b   :  { %594 = vmatpush.msrb.mxu3 %v2450_v19  ;;  %555 = vmatpush.msrb.mxu2 %v2594_v59 }
  0x4c   :  { %314 = vmatmul.f32.vlgmr.msra.gmra.mxu2 %v3229_v58  ;;  %454 = vmatpush.msrb.mxu0 %v2584_v39 }
  0x4d   :  { %596 = vmatpush.msrb.mxu3 %v2476_v29  ;;  %559 = vmatpush.msrb.mxu2 %v2608_v7 }
  0x4e   :  { %494 = vmatpush.msrb.mxu1 %v2532_v57  ;;  %415 = vmatmul.f32.vlgmr.msra.gmra.mxu3 %v3229_v58 }
  0x4f   :  { %598 = vmatpush.msrb.mxu3 %v2501_v42  ;;  %563 = vmatpush.msrb.mxu2 %v2623_v44 }
  0x50   :  { %457 = vmatpush.msrb.mxu0 %v2599_v49  ;;  %496 = vmatpush.msrb.mxu1 %v2546_v62 }
  0x51   :  { %600 = vmatpush.msrb.mxu3 %v2519_v51  ;;  %567 = vmatpush.msrb.mxu2 %v2638_v46 }
  0x52   :  { %460 = vmatpush.msrb.mxu0 %v2613_v45  ;;  %498 = vmatpush.msrb.mxu1 %v2565_v13 }
  0x53   :  { %602 = vmatpush.msrb.mxu3 %v2532_v57  ;;  %571 = vmatpush.msrb.mxu2 %v2651_v6 }
  0x54   :  { %463 = vmatpush.msrb.mxu0 %v2626_v53  ;;  %500 = vmatpush.msrb.mxu1 %v2581_v38 }
  0x55   :  { %604 = vmatpush.msrb.mxu3 %v2546_v62  ;;  %575 = vmatpush.msrb.mxu2 %v2661_v17 }
  0x56   :  { %577 = vmatmul.f32.vlgmr.msrb.gmra.mxu2 %v3229_v58  ;;  %466 = vmatpush.msrb.mxu0 %v2641_v33 }
  0x57   :  { %606 = vmatpush.msrb.mxu3 %v2565_v13  ;;  %502 = vmatpush.msrb.mxu1 %v2596_v50 }
  0x58   :  { %469 = vmatmul.f32.vlgmr.msrb.gmra.mxu0 %v3229_v58  ;;  %793 = vmatpush.msra.mxu2 %v2439_v14 }
  0x59   :  { %608 = vmatpush.msrb.mxu3 %v2581_v38  ;;  %504 = vmatpush.msrb.mxu1 %v2610_v54 }
  0x5a   :  { %650 = vmatpush.msra.mxu0 %v2425_v3  ;;  %508 = vmatmul.f32.vlgmr.msrb.gmra.mxu1 %v3229_v58 }
  0x5b   :  { %610 = vmatpush.msrb.mxu3 %v2596_v50  ;;  %695 = vmatpush.msra.mxu1 %v2496_v40 }
  0x5c   :  { %652 = vmatpush.msra.mxu0 %v2427_v4  ;;  %796 = vmatpush.msra.mxu2 %v2442_v15 }
  0x5d   :  { %612 = vmatpush.msrb.mxu3 %v2610_v54  ;;  %701 = vmatpush.msra.mxu1 %v2499_v41 }
  0x5e   :  { %614 = vmatmul.f32.vlgmr.msrb.gmra.mxu3 %v3229_v58  ;;  %654 = vmatpush.msra.mxu0 %v2429_v5  ;;  %v3317_v58 = vld [vmem:[#allocation33_spill] sm:$0xff] }
  0x5f   :  { %707 = vmatpush.msra.mxu1 %v3313_v55  ;;  %846 = vmatpush.msra.mxu3 %v2425_v3 }
  0x60   :  { %656 = vmatpush.msra.mxu0 %v2431_v9  ;;  %799 = vmatpush.msra.mxu2 %v2445_v16 }
  0x61   :  { %713 = vmatpush.msra.mxu1 %v3314_v1  ;;  %848 = vmatpush.msra.mxu3 %v2427_v4 }
  0x62   :  { %658 = vmatpush.msra.mxu0 %v2433_v10  ;;  %802 = vmatpush.msra.mxu2 %v2448_v18 }
  0x63   :  { %719 = vmatpush.msra.mxu1 %v3315_v8  ;;  %850 = vmatpush.msra.mxu3 %v2429_v5 }
  0x64   :  { %660 = vmatpush.msra.mxu0 %v2435_v11  ;;  %805 = vmatpush.msra.mxu2 %v2453_v20 }
  0x65   :  { %725 = vmatpush.msra.mxu1 %v2576_v34  ;;  %852 = vmatpush.msra.mxu3 %v2431_v9 }
  0x66   :  { %662 = vmatpush.msra.mxu0 %v2450_v19  ;;  %808 = vmatpush.msra.mxu2 %v2456_v21 }
  0x67   :  { %731 = vmatpush.msra.mxu1 %v3316_v22  ;;  %854 = vmatpush.msra.mxu3 %v2433_v10 }
  0x68   :  { %664 = vmatpush.msra.mxu0 %v2476_v29  ;;  %811 = vmatpush.msra.mxu2 %v2494_v37 }
  0x69   :  { %737 = vmatpush.msra.mxu1 %v2601_v63  ;;  %856 = vmatpush.msra.mxu3 %v2435_v11 }
  0x6a   :  { %666 = vmatpush.msra.mxu0 %v2501_v42  ;;  %814 = vmatpush.msra.mxu2 %v2522_v52 }
  0x6b   :  { %743 = vmatpush.msra.mxu1 %v3317_v58  ;;  %858 = vmatpush.msra.mxu3 %v2450_v19 }
  0x6c   :  { %668 = vmatpush.msra.mxu0 %v2519_v51  ;;  %817 = vmatpush.msra.mxu2 %v2544_v61 }
  0x6d   :  { %749 = vmatpush.msra.mxu1 %v2633_v47  ;;  %860 = vmatpush.msra.mxu3 %v2476_v29 }
  0x6e   :  { %670 = vmatpush.msra.mxu0 %v2532_v57  ;;  %820 = vmatpush.msra.mxu2 %v2555_v2 }
  0x6f   :  { %755 = vmatpush.msra.mxu1 %v2646_v43  ;;  %862 = vmatpush.msra.mxu3 %v2501_v42 }
  0x70   :  { %672 = vmatpush.msra.mxu0 %v2546_v62  ;;  %823 = vmatpush.msra.mxu2 %v2572_v32 }
  0x71   :  { %761 = vmatpush.msra.mxu1 %v2656_v56  ;;  %864 = vmatpush.msra.mxu3 %v2519_v51 }
  0x72   :  { %674 = vmatpush.msra.mxu0 %v2565_v13  ;;  %826 = vmatpush.msra.mxu2 %v2584_v39 }
  0x73   :  { %767 = vmatpush.msra.mxu1 %v2668_v26  ;;  %866 = vmatpush.msra.mxu3 %v2532_v57 }
  0x74   :  { %676 = vmatpush.msra.mxu0 %v2581_v38  ;;  %829 = vmatpush.msra.mxu2 %v2599_v49 }
  0x75   :  { %773 = vmatpush.msra.mxu1 %v2677_v0  ;;  %868 = vmatpush.msra.mxu3 %v2546_v62 }
  0x76   :  { %678 = vmatpush.msra.mxu0 %v2596_v50  ;;  %832 = vmatpush.msra.mxu2 %v2613_v45 }
  0x77   :  { %779 = vmatpush.msra.mxu1 %v2684_v31  ;;  %870 = vmatpush.msra.mxu3 %v2565_v13 }
  0x78   :  { %680 = vmatpush.msra.mxu0 %v2610_v54  ;;  %835 = vmatpush.msra.mxu2 %v2626_v53 }
  0x79   :  { %785 = vmatpush.msra.mxu1 %v2690_v35  ;;  %872 = vmatpush.msra.mxu3 %v2581_v38 }
  0x7a   :  { %887 = vmatpush.msrb.mxu0 %v2460_v23  ;;  %838 = vmatpush.msra.mxu2 %v2641_v33 }
  0x7b   :  { %954 = vmatpush.msrb.mxu1 %v2425_v3  ;;  %874 = vmatpush.msra.mxu3 %v2596_v50 }
  0x7c   :  { %891 = vmatpush.msrb.mxu0 %v2463_v24  ;;  %1028 = vmatpush.msrb.mxu2 %v2425_v3 }
  0x7d   :  { %956 = vmatpush.msrb.mxu1 %v2427_v4  ;;  %876 = vmatpush.msra.mxu3 %v2610_v54 }
  0x7e   :  { %895 = vmatpush.msrb.mxu0 %v2466_v25  ;;  %1030 = vmatpush.msrb.mxu2 %v2427_v4 }
  0x7f   :  { %958 = vmatpush.msrb.mxu1 %v2429_v5  ;;  %1073 = vmatpush.msrb.mxu3 %v2496_v40 }
  0x80   :  { %899 = vmatpush.msrb.mxu0 %v2471_v27  ;;  %1032 = vmatpush.msrb.mxu2 %v2429_v5 }
  0x81   :  { %960 = vmatpush.msrb.mxu1 %v2431_v9  ;;  %1079 = vmatpush.msrb.mxu3 %v2499_v41 }
  0x82   :  { %903 = vmatpush.msrb.mxu0 %v2474_v28  ;;  %1034 = vmatpush.msrb.mxu2 %v2431_v9 }
  0x83   :  { %962 = vmatpush.msrb.mxu1 %v2433_v10  ;;  %1085 = vmatpush.msrb.mxu3 %v3313_v55 }
  0x84   :  { %907 = vmatpush.msrb.mxu0 %v2479_v30  ;;  %1036 = vmatpush.msrb.mxu2 %v2433_v10 }
  0x85   :  { %964 = vmatpush.msrb.mxu1 %v2435_v11  ;;  %1091 = vmatpush.msrb.mxu3 %v3314_v1 }
  0x86   :  { %911 = vmatpush.msrb.mxu0 %v2514_v48  ;;  %1038 = vmatpush.msrb.mxu2 %v2435_v11 }
  0x87   :  { %966 = vmatpush.msrb.mxu1 %v2450_v19  ;;  %1097 = vmatpush.msrb.mxu3 %v3315_v8 }
  0x88   :  { %915 = vmatpush.msrb.mxu0 %v2541_v60  ;;  %1040 = vmatpush.msrb.mxu2 %v2450_v19 }
  0x89   :  { %968 = vmatpush.msrb.mxu1 %v2476_v29  ;;  %1103 = vmatpush.msrb.mxu3 %v2576_v34 }
  0x8a   :  { %919 = vmatpush.msrb.mxu0 %v2563_v12  ;;  %1042 = vmatpush.msrb.mxu2 %v2476_v29 }
  0x8b   :  { %970 = vmatpush.msrb.mxu1 %v2501_v42  ;;  %1109 = vmatpush.msrb.mxu3 %v3316_v22 }
  0x8c   :  { %923 = vmatpush.msrb.mxu0 %v2579_v36  ;;  %1044 = vmatpush.msrb.mxu2 %v2501_v42 }
  0x8d   :  { %972 = vmatpush.msrb.mxu1 %v2519_v51  ;;  %1115 = vmatpush.msrb.mxu3 %v2601_v63  ;;  %v623_v63 = vld [vmem:[#allocation6 + $0x8] sm:$0xff] }
  0x8e   :  { %927 = vmatpush.msrb.mxu0 %v2594_v59  ;;  %1046 = vmatpush.msrb.mxu2 %v2519_v51 }
  0x8f   :  { %974 = vmatpush.msrb.mxu1 %v2532_v57  ;;  %1121 = vmatpush.msrb.mxu3 %v3317_v58 }
  0x90   :  { %931 = vmatpush.msrb.mxu0 %v2608_v7  ;;  %1048 = vmatpush.msrb.mxu2 %v2532_v57 }
  0x91   :  { %976 = vmatpush.msrb.mxu1 %v2546_v62  ;;  %1127 = vmatpush.msrb.mxu3 %v2633_v47 }
  0x92   :  { %935 = vmatpush.msrb.mxu0 %v2623_v44  ;;  %1050 = vmatpush.msrb.mxu2 %v2546_v62 }
  0x93   :  { %978 = vmatpush.msrb.mxu1 %v2565_v13  ;;  %1133 = vmatpush.msrb.mxu3 %v2646_v43 }
  0x94   :  { %939 = vmatpush.msrb.mxu0 %v2638_v46  ;;  %1052 = vmatpush.msrb.mxu2 %v2565_v13 }
  0x95   :  { %980 = vmatpush.msrb.mxu1 %v2581_v38  ;;  %1139 = vmatpush.msrb.mxu3 %v2656_v56 }
  0x96   :  { %943 = vmatpush.msrb.mxu0 %v2651_v6  ;;  %1054 = vmatpush.msrb.mxu2 %v2581_v38 }
  0x97   :  { %982 = vmatpush.msrb.mxu1 %v2596_v50  ;;  %1145 = vmatpush.msrb.mxu3 %v2668_v26  ;;  %v2213_v26 = vld [vmem:[%s3214_s3] ss:$0 sm:$0xff]  ;;  %s2375_s3 = smov [#allocation11]  }
  0x98   :  { %947 = vmatpush.msrb.mxu0 %v2661_v17  ;;  %1056 = vmatpush.msrb.mxu2 %v2596_v50  ;;  %s2159_s17 = sshll.u32 %s2375_s3, 4  ;;  %s2160_s17 = int_to_ptr.vmem [resolvable:$true] %s2159_s17 }
  0x99   :  { %984 = vmatpush.msrb.mxu1 %v2610_v54  ;;  %1151 = vmatpush.msrb.mxu3 %v2677_v0  ;;  %v625_v0 = vmul.f32 0.0, %v623_v63 }
  0x9a   :  { %1058 = vmatpush.msrb.mxu2 %v2610_v54 }
  0x9b   :  { %1157 = vmatpush.msrb.mxu3 %v2684_v31  ;;  %v626_v55 = vrot.slane %v625_v0, 4 }
  0x9d   :  { %1163 = vmatpush.msrb.mxu3 %v2690_v35  ;;  %v627_v41 = vadd.f32 %v626_v55, %v625_v0  ;;  %v3321_v55 = vld [vmem:[#allocation25_spill] sm:$0xff] }
  0x9f   :  { %v628_v49 = vrot.slane %v627_v41, 2 }
  0xa1   :  { %v629_v7 = vadd.f32 %v628_v49, %v627_v41  ;;  %v3318_v41 = vmov 0.0  }
  0xa7   :  { %v120_v56 = vpop.f32.mrf.mxu0  ;;  %v151_v43 = vpop.f32.mrf.mxu1 }
  0xa8   :  { %v121_v34 = vadd.f32 %v2213_v26, %v120_v56 }
  0xaa   :  { %v152_v31 = vadd.f32 %v151_v43, %v121_v34  ;;  %v630_v34 = vrot.slane %v629_v7, 1 }
  0xac   :  { %v631_v43 = vadd.f32 %v630_v34, %v629_v7  ;;  %v3327_v34 = vld [vmem:[#allocation32_spill] sm:$0xff] }
  0xaf   :  { %v177_v47 = vpop.f32.mrf.mxu0  ;;  %v202_v58 = vpop.f32.mrf.mxu1 }
  0xb0   :  { %v178_v35 = vadd.f32 %v177_v47, %v152_v31  ;;  %v3319_v31 = vld [vmem:[#allocation27_spill] sm:$0xff] }
  0xb2   :  { %v203_v46 = vadd.f32 %v202_v58, %v178_v35  ;;  %v3320_v35 = vld [vmem:[#allocation30_spill] sm:$0xff] }
  0xb7   :  { %v229_v22 = vpop.f32.mrf.mxu0  ;;  %v252_v8 = vpop.f32.mrf.mxu1 }
  0xb8   :  { %v230_v54 = vadd.f32 %v229_v22, %v203_v46  ;;  %v3324_v22 = vld [vmem:[#allocation28_spill] sm:$0xff] }
  0xba   :  { %v2891_v26 = vadd.f32 %v252_v8, %v230_v54  ;;  %v3323_v8 = vld [vmem:[#allocation34_spill] sm:$0xff] }
  0xcf   :  { %v315_v1 = vpop.f32.mrf.mxu2 }
  0xd1   :  { %v416_v33 = vpop.f32.mrf.mxu3 }
  0xd2   :  { %v417_v17 = vadd.f32 %v416_v33, %v315_v1  ;;  %v3322_v1 = vld [vmem:[#allocation31_spill] sm:$0xff] }
  0xd5   :  { %v470_v53 = vpop.f32.mrf.mxu0 }
  0xd6   :  { %v471_v6 = vadd.f32 %v470_v53, %v417_v17 }
  0xd7   :  { %v509_v45 = vpop.f32.mrf.mxu1 }
  0xd8   :  { %v510_v40 = vadd.f32 %v509_v45, %v471_v6 }
  0xd9   :  { %v578_v44 = vpop.f32.mrf.mxu2 }
  0xda   :  { %v579_v39 = vadd.f32 %v578_v44, %v510_v40 }
  0xe1   :  { %v615_v56 = vpop.f32.mrf.mxu3 }
  0xe2   :  { %v616_v63 = vadd.f32 %v615_v56, %v579_v39  ;;  %v3325_v56 = vld [vmem:[#allocation19_spill] sm:$0xff] }
  0xe4   :  { %v619_v50 = vrot.slane %v616_v63, 7  ;;  %v3326_v63 = vld [vmem:[#allocation37_spill] sm:$0xff] }
  0xe6   :  { %v621_v33 = vadd.f32 %v619_v50, %v2891_v26 }
  0xe8   :  { %v632_v47 = vmul.f32 2.0, %v621_v33  ;;  %v3328_v33 = vld [vmem:[#allocation20_spill] sm:$0xff] }
  0xea   :  { %v633_v53 = vadd.f32 -70.0, %v632_v47  ;;  %v3330_v47 = vld [vmem:[#allocation35_spill] sm:$0xff] }
  0xec   :  { %v634_v17 = vsub.f32 %v633_v53, %v631_v43  ;;  %v3329_v43 = vld [vmem:[#allocation40_spill] sm:$0xff]  ;;  %v3331_v53 = vld [vmem:[#allocation21_spill] sm:$0xff] }
  0xee   :  { %v2189_v0 = vadd.f32 70.0, %v634_v17 }
  0xf0   :  { %v636_v58 = vmul.f32 0.0, %v2189_v0  ;;  %v3333_v0 = vld [vmem:[#allocation38_spill] sm:$0xff] }
  0xf2   :  { %v2894_v45 = vsub.f32 %v634_v17, %v636_v58  ;;  %v3332_v17 = vld [vmem:[#allocation42_spill] sm:$0xff] }
  0xf3   :  { %v3334_v58 = vld [vmem:[#allocation22_spill] sm:$0xff] }
  0xf4   :  { %v2190_v46 = vadd.f32 70.0, %v2894_v45  ;;  %641 = vst [vmem:[#allocation12] sm:$0x2] %v2894_v45  ;;  %v2191_v40 = vadd.f32 50.0, %v2894_v45 }
  0xf6   :  { %639 = vst [vmem:[#allocation2 - $0x1] sm:$0x2] %v2190_v46  ;;  %vm643_vm1 = vcmp.gt.f32.partialorder %v2191_v40, 0.0  ;;  %v3335_v46 = vld [vmem:[#allocation23_spill] sm:$0xff]  ;;  %v3336_v40 = vld [vmem:[#allocation24_spill] sm:$0xff] }
  0xf7   :  { %v2900_v54 = vsel %vm643_vm1, 1.0, %v3318_v41 }
  0xf8   :  { %v647_v50 = vrot.slane %v2900_v54, 1  ;;  %1018 = vst [vmem:[#allocation11 + $0x1] sm:$0x2] %v2900_v54 }
  0xfa   :  { %v681_v7 = vand.u32 4294901760, %v647_v50 }
  0xfc   :  { %787 = vmatmul.f32.vlgmr.msra.gmra.mxu1 %v681_v7  ;;  %v682_v39 = vsub.f32 %v647_v50, %v681_v7  ;;  %v3337_v50 = vld [vmem:[#allocation26_spill] sm:$0xff] }
  0xfd   :  { %1224 = vmatpush.msra.mxu1 %v2425_v3 }
  0xfe   :  { %841 = vmatmul.f32.vlgmr.msra.gmra.mxu2 %v682_v39  ;;  %v683_v49 = vand.u32 4294901760, %v682_v39 }
  0xff   :  { %1226 = vmatpush.msra.mxu1 %v2427_v4  ;;  %1265 = vmatpush.msra.mxu2 %v2460_v23 }
 0x100   :  { %880 = vmatmul.f32.vlgmr.msra.gmra.mxu3 %v683_v49  ;;  %v684_v44 = vsub.f32 %v682_v39, %v683_v49  ;;  %v3339_v39 = vld [vmem:[#allocation33_spill] sm:$0xff]  ;;  %v3340_v49 = vld [vmem:[#allocation36_spill] sm:$0xff] }
 0x101   :  { %1228 = vmatpush.msra.mxu1 %v2429_v5  ;;  %1332 = vmatpush.msra.mxu3 %v2425_v3 }
 0x102   :  { %v685_v6 = vand.u32 4294901760, %v684_v44  ;;  %1269 = vmatpush.msra.mxu2 %v2463_v24  ;;  %v3341_v44 = vld [vmem:[#allocation39_spill] sm:$0xff] }
 0x103   :  { %1230 = vmatpush.msra.mxu1 %v2431_v9  ;;  %1334 = vmatpush.msra.mxu3 %v2427_v4 }
 0x104   :  { %686 = vmatmul.f32.vlgmr.msra.gmra.mxu0 %v685_v6  ;;  %986 = vmatmul.f32.vlgmr.msrb.gmra.mxu1 %v681_v7  ;;  %v3342_v6 = vld [vmem:[#allocation41_spill] sm:$0xff] }
 0x105   :  { %1171 = vmatpush.msra.mxu0 %v2439_v14  ;;  %1232 = vmatpush.msra.mxu1 %v2433_v10 }
 0x106   :  { %1336 = vmatpush.msra.mxu3 %v2429_v5  ;;  %1273 = vmatpush.msra.mxu2 %v2466_v25 }
 0x107   :  { %1174 = vmatpush.msra.mxu0 %v2442_v15  ;;  %1234 = vmatpush.msra.mxu1 %v2435_v11 }
 0x108   :  { %1338 = vmatpush.msra.mxu3 %v2431_v9  ;;  %1277 = vmatpush.msra.mxu2 %v2471_v27 }
 0x109   :  { %1177 = vmatpush.msra.mxu0 %v2445_v16  ;;  %1236 = vmatpush.msra.mxu1 %v2450_v19 }
 0x10a   :  { %1340 = vmatpush.msra.mxu3 %v2433_v10  ;;  %1281 = vmatpush.msra.mxu2 %v2474_v28 }
 0x10b   :  { %1180 = vmatpush.msra.mxu0 %v2448_v18  ;;  %1238 = vmatpush.msra.mxu1 %v2476_v29 }
 0x10c   :  { %949 = vmatmul.f32.vlgmr.msrb.gmra.mxu0 %v681_v7  ;;  %1342 = vmatpush.msra.mxu3 %v2435_v11  ;;  %v3338_v7 = vld [vmem:[#allocation29_spill] sm:$0xff] }
 0x10d   :  { %1183 = vmatpush.msra.mxu0 %v2453_v20  ;;  %1240 = vmatpush.msra.mxu1 %v2501_v42 }
 0x10e   :  { %1344 = vmatpush.msra.mxu3 %v2450_v19  ;;  %1285 = vmatpush.msra.mxu2 %v2479_v30 }
 0x10f   :  { %1186 = vmatpush.msra.mxu0 %v2456_v21  ;;  %1242 = vmatpush.msra.mxu1 %v2519_v51 }
 0x110   :  { %1346 = vmatpush.msra.mxu3 %v2476_v29  ;;  %1289 = vmatpush.msra.mxu2 %v2514_v48 }
 0x111   :  { %1189 = vmatpush.msra.mxu0 %v2494_v37  ;;  %1244 = vmatpush.msra.mxu1 %v2532_v57 }
 0x112   :  { %1348 = vmatpush.msra.mxu3 %v2501_v42  ;;  %1293 = vmatpush.msra.mxu2 %v2541_v60 }
 0x113   :  { %1192 = vmatpush.msra.mxu0 %v2522_v52  ;;  %1246 = vmatpush.msra.mxu1 %v2546_v62 }
 0x114   :  { %1350 = vmatpush.msra.mxu3 %v2519_v51  ;;  %1297 = vmatpush.msra.mxu2 %v2563_v12 }
 0x115   :  { %1195 = vmatpush.msra.mxu0 %v2544_v61  ;;  %1248 = vmatpush.msra.mxu1 %v2565_v13 }
 0x116   :  { %1352 = vmatpush.msra.mxu3 %v2532_v57  ;;  %1301 = vmatpush.msra.mxu2 %v2579_v36 }
 0x117   :  { %1198 = vmatpush.msra.mxu0 %v2555_v2  ;;  %1250 = vmatpush.msra.mxu1 %v2581_v38 }
 0x118   :  { %1354 = vmatpush.msra.mxu3 %v2546_v62  ;;  %1305 = vmatpush.msra.mxu2 %v2594_v59 }
 0x119   :  { %1201 = vmatpush.msra.mxu0 %v2572_v32  ;;  %1252 = vmatpush.msra.mxu1 %v3319_v31 }
 0x11a   :  { %1356 = vmatpush.msra.mxu3 %v2565_v13  ;;  %1309 = vmatpush.msra.mxu2 %v3320_v35 }
 0x11b   :  { %1204 = vmatpush.msra.mxu0 %v3321_v55  ;;  %1254 = vmatpush.msra.mxu1 %v3322_v1 }
 0x11c   :  { %1358 = vmatpush.msra.mxu3 %v2581_v38  ;;  %1313 = vmatpush.msra.mxu2 %v3323_v8 }
 0x11d   :  { %1207 = vmatpush.msra.mxu0 %v3324_v22  ;;  %1451 = vmatpush.msrb.mxu1 %v3325_v56  ;;  %v1004_v56 = vsub.f32 -70.0, %v2894_v45 }
 0x11e   :  { %1360 = vmatpush.msra.mxu3 %v3319_v31  ;;  %1317 = vmatpush.msra.mxu2 %v3326_v63 }
 0x11f   :  { %1210 = vmatpush.msra.mxu0 %v3327_v34  ;;  %1457 = vmatpush.msrb.mxu1 %v3328_v33 }
 0x120   :  { %1362 = vmatpush.msra.mxu3 %v3322_v1  ;;  %1321 = vmatpush.msra.mxu2 %v3329_v43 }
 0x121   :  { %1213 = vmatpush.msra.mxu0 %v3330_v47  ;;  %1463 = vmatpush.msrb.mxu1 %v3331_v53 }
 0x122   :  { %1325 = vmatpush.msra.mxu2 %v3332_v17 }
 0x123   :  { %1216 = vmatpush.msra.mxu0 %v3333_v0  ;;  %1469 = vmatpush.msrb.mxu1 %v3334_v58 }
 0x125   :  { %1406 = vmatpush.msrb.mxu0 %v2425_v3  ;;  %1475 = vmatpush.msrb.mxu1 %v3335_v46 }
 0x127   :  { %1408 = vmatpush.msrb.mxu0 %v2427_v4  ;;  %1481 = vmatpush.msrb.mxu1 %v3336_v40 }
 0x129   :  { %1410 = vmatpush.msrb.mxu0 %v2429_v5  ;;  %1487 = vmatpush.msrb.mxu1 %v3337_v50  ;;  %v3343_v50 = vld [vmem:[#allocation43_spill] sm:$0xff] }
 0x12b   :  { %1412 = vmatpush.msrb.mxu0 %v2431_v9  ;;  %1493 = vmatpush.msrb.mxu1 %v3338_v7  ;;  %v3344_v7 = vld [vmem:[#allocation44_spill] sm:$0xff] }
 0x12d   :  { %1414 = vmatpush.msrb.mxu0 %v2433_v10  ;;  %1499 = vmatpush.msrb.mxu1 %v3339_v39  ;;  %v3345_v39 = vld [vmem:[#allocation45_spill] sm:$0xff] }
 0x12f   :  { %1416 = vmatpush.msrb.mxu0 %v2435_v11  ;;  %1505 = vmatpush.msrb.mxu1 %v3340_v49  ;;  %v3346_v49 = vld [vmem:[#allocation46_spill] sm:$0xff] }
 0x131   :  { %1418 = vmatpush.msrb.mxu0 %v2450_v19  ;;  %1511 = vmatpush.msrb.mxu1 %v3341_v44 }
 0x133   :  { %1420 = vmatpush.msrb.mxu0 %v2476_v29  ;;  %1517 = vmatpush.msrb.mxu1 %v3342_v6  ;;  %v996_v6 = vld [vmem:[#allocation2] sm:$0xff] }
 0x135   :  { %1422 = vmatpush.msrb.mxu0 %v2501_v42  ;;  %1523 = vmatpush.msrb.mxu1 %v3343_v50  ;;  %v995_v50 = vld [vmem:[#allocation6 + $0x10] sm:$0xff] }
 0x136   :  { %v997_v44 = vmul.f32 %v996_v6, %v995_v50  ;;  %v1005_v6 = vmul.f32 0.046569187, %v1004_v56 }
 0x137   :  { %1424 = vmatpush.msrb.mxu0 %v2519_v51  ;;  %1529 = vmatpush.msrb.mxu1 %v3344_v7 }
 0x138   :  { %v998_v58 = vrot.slane %v997_v44, 4 }
 0x139   :  { %1426 = vmatpush.msrb.mxu0 %v2532_v57  ;;  %1535 = vmatpush.msrb.mxu1 %v3345_v39 }
 0x13a   :  { %v999_v17 = vadd.f32 %v998_v58, %v997_v44  ;;  %v3349_v44 = vld [vmem:[#allocation28_spill] sm:$0xff] }
 0x13b   :  { %1428 = vmatpush.msrb.mxu0 %v2546_v62  ;;  %1541 = vmatpush.msrb.mxu1 %v3346_v49 }
 0x13c   :  { %v1000_v33 = vrot.slane %v999_v17, 2 }
 0x13d   :  { %1430 = vmatpush.msrb.mxu0 %v2565_v13 }
 0x13e   :  { %v1001_v8 = vadd.f32 %v1000_v33, %v999_v17  ;;  %v3348_v17 = vld [vmem:[#allocation34_spill] sm:$0xff] }
 0x13f   :  { %1432 = vmatpush.msrb.mxu0 %v2581_v38 }
 0x141   :  { %1434 = vmatpush.msrb.mxu0 %v3319_v31 }
 0x143   :  { %1436 = vmatpush.msrb.mxu0 %v3322_v1  ;;  %v1002_v1 = vrot.slane %v1001_v8, 1 }
 0x145   :  { %v1003_v58 = vadd.f32 %v1002_v1, %v1001_v8 }
 0x179   :  { %v788_v7 = vpop.f32.mrf.mxu1 }
 0x181   :  { %v687_v40 = vpop.f32.mrf.mxu0  ;;  %v842_v39 = vpop.f32.mrf.mxu2 }
 0x182   :  { %v789_v46 = vadd.f32 %v788_v7, %v687_v40  ;;  %v987_v34 = vpop.f32.mrf.mxu1  ;;  %v1006_v7 = vadd.f32 %v1005_v6, %v2894_v45  ;;  %v3351_v6 = vld [vmem:[#allocation37_spill] sm:$0xff] }
 0x183   :  { %v881_v53 = vpop.f32.mrf.mxu3 }
 0x184   :  { %v843_v0 = vadd.f32 %v842_v39, %v789_v46 }
 0x186   :  { %v882_v49 = vadd.f32 %v881_v53, %v843_v0 }
 0x189   :  { %v950_v47 = vpop.f32.mrf.mxu0 }
 0x18a   :  { %v951_v43 = vadd.f32 %v950_v47, %v882_v49 }
 0x18c   :  { %v988_v63 = vadd.f32 %v987_v34, %v951_v43  ;;  %v3347_v43 = vld [vmem:[#allocation31_spill] sm:$0xff] }
 0x18e   :  { %v991_v22 = vrot.slane %v988_v63, 6 }
 0x190   :  { %v993_v50 = vadd.f32 %v991_v22, %v2891_v26 }
 0x192   :  { %v1007_v40 = vmul.f32 1.8627676, %v993_v50  ;;  %v3350_v50 = vld [vmem:[#allocation19_spill] sm:$0xff] }
 0x194   :  { %v1009_v46 = vrot.slane %v1007_v40, 1  ;;  %v3352_v40 = vld [vmem:[#allocation32_spill] sm:$0xff] }
 0x196   :  { %v1011_v39 = vadd.f32 %v1009_v46, %v1006_v7  ;;  %v3353_v7 = vld [vmem:[#allocation20_spill] sm:$0xff] }
 0x197   :  { %v3354_v46 = vld [vmem:[#allocation40_spill] sm:$0xff] }
 0x198   :  { %v1012_v53 = vsub.f32 %v1011_v39, %v1003_v58  ;;  %v3355_v58 = vld [vmem:[#allocation35_spill] sm:$0xff]  ;;  %v3356_v39 = vld [vmem:[#allocation21_spill] sm:$0xff] }
 0x19a   :  { %v2193_v0 = vadd.f32 70.0, %v1012_v53 }
 0x19c   :  { %v1014_v47 = vmul.f32 %v2193_v0, %v2900_v54  ;;  %v3358_v0 = vld [vmem:[#allocation38_spill] sm:$0xff] }
 0x19e   :  { %v3004_v49 = vsub.f32 %v1012_v53, %v1014_v47  ;;  %v3357_v53 = vld [vmem:[#allocation42_spill] sm:$0xff] }
 0x19f   :  { %v3359_v47 = vld [vmem:[#allocation22_spill] sm:$0xff] }
 0x1a0   :  { %v1016_v63 = vsub.f32 %v3004_v49, %v2894_v45  ;;  %1019 = vst [vmem:[#allocation12 + $0x1] sm:$0x2] %v3004_v49  ;;  %v2194_v22 = vadd.f32 50.0, %v3004_v49 }
 0x1a2   :  { %1017 = vst [vmem:[#allocation2] sm:$0x2] %v1016_v63  ;;  %vm1021_vm2 = vcmp.gt.f32.partialorder %v2194_v22, 0.0  ;;  %v3360_v63 = vld [vmem:[#allocation23_spill] sm:$0xff]  ;;  %v3361_v22 = vld [vmem:[#allocation24_spill] sm:$0xff] }
 0x1a3   :  { %v3011_v56 = vsel %vm1021_vm2, 1.0, %v3318_v41 }
 0x1a4   :  { %v1025_v1 = vrot.slane %v3011_v56, 1  ;;  %1396 = vst [vmem:[#allocation11 + $0x2] sm:$0x2] %v3011_v56 }
 0x1a6   :  { %v1059_v8 = vand.u32 4294901760, %v1025_v1 }
 0x1a8   :  { %1165 = vmatmul.f32.vlgmr.msrb.gmra.mxu3 %v1059_v8  ;;  %v1060_v54 = vsub.f32 %v1025_v1, %v1059_v8  ;;  %v3362_v1 = vld [vmem:[#allocation26_spill] sm:$0xff] }
 0x1a9   :  { %1602 = vmatpush.msrb.mxu3 %v2425_v3 }
 0x1aa   :  { %1219 = vmatmul.f32.vlgmr.msra.gmra.mxu0 %v1060_v54  ;;  %v1061_v45 = vand.u32 4294901760, %v1060_v54 }
 0x1ab   :  { %1604 = vmatpush.msrb.mxu3 %v2427_v4  ;;  %1643 = vmatpush.msra.mxu0 %v2460_v23 }
 0x1ac   :  { %1258 = vmatmul.f32.vlgmr.msra.gmra.mxu1 %v1061_v45  ;;  %v1062_v34 = vsub.f32 %v1060_v54, %v1061_v45  ;;  %v3364_v54 = vld [vmem:[#allocation33_spill] sm:$0xff]  ;;  %v3365_v45 = vld [vmem:[#allocation36_spill] sm:$0xff] }
 0x1ad   :  { %1606 = vmatpush.msrb.mxu3 %v2429_v5  ;;  %1710 = vmatpush.msra.mxu1 %v2425_v3 }
 0x1ae   :  { %v1063_v33 = vand.u32 4294901760, %v1062_v34  ;;  %1647 = vmatpush.msra.mxu0 %v2463_v24  ;;  %v3366_v34 = vld [vmem:[#allocation39_spill] sm:$0xff] }
 0x1af   :  { %1608 = vmatpush.msrb.mxu3 %v2431_v9  ;;  %1712 = vmatpush.msra.mxu1 %v2427_v4 }
 0x1b0   :  { %1064 = vmatmul.f32.vlgmr.msrb.gmra.mxu2 %v1063_v33  ;;  %1364 = vmatmul.f32.vlgmr.msra.gmra.mxu3 %v1059_v8  ;;  %v3367_v33 = vld [vmem:[#allocation41_spill] sm:$0xff] }
 0x1b1   :  { %1549 = vmatpush.msrb.mxu2 %v2439_v14  ;;  %1610 = vmatpush.msrb.mxu3 %v2433_v10 }
 0x1b2   :  { %1714 = vmatpush.msra.mxu1 %v2429_v5  ;;  %1651 = vmatpush.msra.mxu0 %v2466_v25 }
 0x1b3   :  { %1552 = vmatpush.msrb.mxu2 %v2442_v15  ;;  %1612 = vmatpush.msrb.mxu3 %v2435_v11 }
 0x1b4   :  { %1716 = vmatpush.msra.mxu1 %v2431_v9  ;;  %1655 = vmatpush.msra.mxu0 %v2471_v27 }
 0x1b5   :  { %1555 = vmatpush.msrb.mxu2 %v2445_v16  ;;  %1614 = vmatpush.msrb.mxu3 %v2450_v19 }
 0x1b6   :  { %1718 = vmatpush.msra.mxu1 %v2433_v10  ;;  %1659 = vmatpush.msra.mxu0 %v2474_v28 }
 0x1b7   :  { %1558 = vmatpush.msrb.mxu2 %v2448_v18  ;;  %1616 = vmatpush.msrb.mxu3 %v2476_v29 }
 0x1b8   :  { %1327 = vmatmul.f32.vlgmr.msra.gmra.mxu2 %v1059_v8  ;;  %1720 = vmatpush.msra.mxu1 %v2435_v11  ;;  %v3363_v8 = vld [vmem:[#allocation29_spill] sm:$0xff] }
 0x1b9   :  { %1561 = vmatpush.msrb.mxu2 %v2453_v20  ;;  %1618 = vmatpush.msrb.mxu3 %v2501_v42 }
 0x1ba   :  { %1722 = vmatpush.msra.mxu1 %v2450_v19  ;;  %1663 = vmatpush.msra.mxu0 %v2479_v30 }
 0x1bb   :  { %1564 = vmatpush.msrb.mxu2 %v2456_v21  ;;  %1620 = vmatpush.msrb.mxu3 %v2519_v51 }
 0x1bc   :  { %1724 = vmatpush.msra.mxu1 %v2476_v29  ;;  %1667 = vmatpush.msra.mxu0 %v2514_v48 }
 0x1bd   :  { %1567 = vmatpush.msrb.mxu2 %v2494_v37  ;;  %1622 = vmatpush.msrb.mxu3 %v2532_v57 }
 0x1be   :  { %1726 = vmatpush.msra.mxu1 %v2501_v42  ;;  %1671 = vmatpush.msra.mxu0 %v2541_v60 }
 0x1bf   :  { %1570 = vmatpush.msrb.mxu2 %v2522_v52  ;;  %1624 = vmatpush.msrb.mxu3 %v2546_v62 }
 0x1c0   :  { %1728 = vmatpush.msra.mxu1 %v2519_v51  ;;  %1675 = vmatpush.msra.mxu0 %v2563_v12 }
 0x1c1   :  { %1573 = vmatpush.msrb.mxu2 %v2544_v61  ;;  %1626 = vmatpush.msrb.mxu3 %v2565_v13 }
 0x1c2   :  { %1730 = vmatpush.msra.mxu1 %v2532_v57  ;;  %1679 = vmatpush.msra.mxu0 %v2579_v36 }
 0x1c3   :  { %1576 = vmatpush.msrb.mxu2 %v2555_v2  ;;  %1628 = vmatpush.msrb.mxu3 %v2581_v38 }
 0x1c4   :  { %1732 = vmatpush.msra.mxu1 %v2546_v62  ;;  %1683 = vmatpush.msra.mxu0 %v2594_v59 }
 0x1c5   :  { %1579 = vmatpush.msrb.mxu2 %v2572_v32  ;;  %1630 = vmatpush.msrb.mxu3 %v3319_v31 }
 0x1c6   :  { %1734 = vmatpush.msra.mxu1 %v2565_v13  ;;  %1687 = vmatpush.msra.mxu0 %v3320_v35 }
 0x1c7   :  { %1582 = vmatpush.msrb.mxu2 %v3321_v55  ;;  %1632 = vmatpush.msrb.mxu3 %v3347_v43 }
 0x1c8   :  { %1736 = vmatpush.msra.mxu1 %v2581_v38  ;;  %1691 = vmatpush.msra.mxu0 %v3348_v17 }
 0x1c9   :  { %1585 = vmatpush.msrb.mxu2 %v3349_v44  ;;  %1829 = vmatpush.msra.mxu3 %v3350_v50  ;;  %v3368_v50 = vld [vmem:[#allocation43_spill] sm:$0xff] }
 0x1ca   :  { %1738 = vmatpush.msra.mxu1 %v3319_v31  ;;  %1695 = vmatpush.msra.mxu0 %v3351_v6  ;;  %v1382_v6 = vsub.f32 -70.0, %v3004_v49 }
 0x1cb   :  { %1588 = vmatpush.msrb.mxu2 %v3352_v40  ;;  %1835 = vmatpush.msra.mxu3 %v3353_v7  ;;  %v3369_v7 = vld [vmem:[#allocation44_spill] sm:$0xff] }
 0x1cc   :  { %1740 = vmatpush.msra.mxu1 %v3347_v43  ;;  %1699 = vmatpush.msra.mxu0 %v3354_v46 }
 0x1cd   :  { %1591 = vmatpush.msrb.mxu2 %v3355_v58  ;;  %1841 = vmatpush.msra.mxu3 %v3356_v39  ;;  %v3370_v39 = vld [vmem:[#allocation45_spill] sm:$0xff] }
 0x1ce   :  { %1703 = vmatpush.msra.mxu0 %v3357_v53 }
 0x1cf   :  { %1594 = vmatpush.msrb.mxu2 %v3358_v0  ;;  %1847 = vmatpush.msra.mxu3 %v3359_v47  ;;  %v3371_v47 = vld [vmem:[#allocation46_spill] sm:$0xff] }
 0x1d1   :  { %1784 = vmatpush.msra.mxu2 %v2425_v3  ;;  %1853 = vmatpush.msra.mxu3 %v3360_v63  ;;  %v1373_v63 = vld [vmem:[#allocation6 + $0x18] sm:$0xff] }
 0x1d3   :  { %1786 = vmatpush.msra.mxu2 %v2427_v4  ;;  %1859 = vmatpush.msra.mxu3 %v3361_v22  ;;  %v1374_v22 = vld [vmem:[#allocation2] sm:$0xff] }
 0x1d5   :  { %1788 = vmatpush.msra.mxu2 %v2429_v5  ;;  %1865 = vmatpush.msra.mxu3 %v3362_v1  ;;  %v1375_v1 = vmul.f32 %v1374_v22, %v1373_v63  ;;  %v1383_v22 = vmul.f32 0.046569187, %v1382_v6 }
 0x1d7   :  { %1790 = vmatpush.msra.mxu2 %v2431_v9  ;;  %1871 = vmatpush.msra.mxu3 %v3363_v8 }
 0x1d9   :  { %1792 = vmatpush.msra.mxu2 %v2433_v10  ;;  %1877 = vmatpush.msra.mxu3 %v3364_v54 }
 0x1db   :  { %1794 = vmatpush.msra.mxu2 %v2435_v11  ;;  %1883 = vmatpush.msra.mxu3 %v3365_v45 }
 0x1dd   :  { %1796 = vmatpush.msra.mxu2 %v2450_v19  ;;  %1889 = vmatpush.msra.mxu3 %v3366_v34  ;;  %v1376_v34 = vrot.slane %v1375_v1, 4 }
 0x1df   :  { %1798 = vmatpush.msra.mxu2 %v2476_v29  ;;  %1895 = vmatpush.msra.mxu3 %v3367_v33 }
 0x1e1   :  { %1800 = vmatpush.msra.mxu2 %v2501_v42  ;;  %1901 = vmatpush.msra.mxu3 %v3368_v50 }
 0x1e3   :  { %1802 = vmatpush.msra.mxu2 %v2519_v51  ;;  %1907 = vmatpush.msra.mxu3 %v3369_v7  ;;  %v1377_v7 = vadd.f32 %v1376_v34, %v1375_v1 }
 0x1e5   :  { %1804 = vmatpush.msra.mxu2 %v2532_v57  ;;  %1913 = vmatpush.msra.mxu3 %v3370_v39  ;;  %v1378_v58 = vrot.slane %v1377_v7, 2 }
 0x1e7   :  { %1806 = vmatpush.msra.mxu2 %v2546_v62  ;;  %1919 = vmatpush.msra.mxu3 %v3371_v47  ;;  %v1379_v17 = vadd.f32 %v1378_v58, %v1377_v7 }
 0x1e9   :  { %1808 = vmatpush.msra.mxu2 %v2565_v13 }
 0x1eb   :  { %1810 = vmatpush.msra.mxu2 %v2581_v38 }
 0x1ed   :  { %1812 = vmatpush.msra.mxu2 %v3319_v31 }
 0x1ef   :  { %1814 = vmatpush.msra.mxu2 %v3347_v43  ;;  %v1380_v43 = vrot.slane %v1379_v17, 1 }
 0x1f1   :  { %v1381_v1 = vadd.f32 %v1380_v43, %v1379_v17 }
 0x227   :  { %v1220_v33 = vpop.f32.mrf.mxu0 }
 0x229   :  { %v1259_v39 = vpop.f32.mrf.mxu1 }
 0x22b   :  { %v1166_v8 = vpop.f32.mrf.mxu3 }
 0x233   :  { %v1065_v54 = vpop.f32.mrf.mxu2  ;;  %v1365_v46 = vpop.f32.mrf.mxu3 }
 0x234   :  { %v1167_v45 = vadd.f32 %v1166_v8, %v1065_v54  ;;  %v1384_v54 = vadd.f32 %v1383_v22, %v3004_v49 }
 0x236   :  { %v1221_v50 = vadd.f32 %v1220_v33, %v1167_v45 }
 0x238   :  { %v1260_v47 = vadd.f32 %v1259_v39, %v1221_v50 }
 0x23b   :  { %v1328_v0 = vpop.f32.mrf.mxu2 }
 0x23c   :  { %v1329_v53 = vadd.f32 %v1328_v0, %v1260_v47 }
 0x23e   :  { %v1366_v40 = vadd.f32 %v1365_v46, %v1329_v53 }
 0x240   :  { %v1369_v44 = vrot.slane %v1366_v40, 5 }
 0x242   :  { %v1371_v63 = vadd.f32 %v1369_v44, %v2891_v26 }
 0x244   :  { %v1385_v8 = vmul.f32 1.8627676, %v1371_v63 }
 0x246   :  { %v1387_v45 = vrot.slane %v1385_v8, 2 }
 0x248   :  { %v1389_v34 = vadd.f32 %v1387_v45, %v1384_v54 }
 0x24a   :  { %v1390_v33 = vsub.f32 %v1389_v34, %v1381_v1 }
 0x24c   :  { %v2196_v50 = vadd.f32 70.0, %v1390_v33 }
 0x24e   :  { %v1392_v0 = vmul.f32 %v2196_v50, %v3011_v56 }
 0x250   :  { %v3115_v39 = vsub.f32 %v1390_v33, %v1392_v0 }
 0x252   :  { %v1394_v40 = vsub.f32 %v3115_v39, %v3004_v49  ;;  %1397 = vst [vmem:[#allocation12 + $0x2] sm:$0x2] %v3115_v39  ;;  %v2197_v44 = vadd.f32 50.0, %v3115_v39 }
 0x254   :  { %1395 = vst [vmem:[#allocation2 + $0x1] sm:$0x2] %v1394_v40  ;;  %vm1399_vm3 = vcmp.gt.f32.partialorder %v2197_v44, 0.0 }
 0x255   :  { %v3122_v6 = vsel %vm1399_vm3, 1.0, %v3318_v41 }
 0x256   :  { %v1403_v43 = vrot.slane %v3122_v6, 1  ;;  %1774 = vst [vmem:[#allocation11 + $0x3] sm:$0x2] %v3122_v6 }
 0x258   :  { %v1437_v17 = vand.u32 4294901760, %v1403_v43 }
 0x25a   :  { %1543 = vmatmul.f32.vlgmr.msrb.gmra.mxu1 %v1437_v17  ;;  %v1438_v56 = vsub.f32 %v1403_v43, %v1437_v17  ;;  %v2376_v43 = vmov -70.0  }
 0x25b   :  { %1980 = vmatpush.msrb.mxu1 %v2425_v3  ;;  %273 = vst [vmem:[#allocation12] sm:$0x1] %v2376_v43 }
 0x25c   :  { %1597 = vmatmul.f32.vlgmr.msrb.gmra.mxu2 %v1438_v56  ;;  %v1439_v49 = vand.u32 4294901760, %v1438_v56 }
 0x25d   :  { %1982 = vmatpush.msrb.mxu1 %v2427_v4  ;;  %2021 = vmatpush.msrb.mxu2 %v2460_v23 }
 0x25e   :  { %1636 = vmatmul.f32.vlgmr.msrb.gmra.mxu3 %v1439_v49  ;;  %v1440_v46 = vsub.f32 %v1438_v56, %v1439_v49 }
 0x25f   :  { %1984 = vmatpush.msrb.mxu1 %v2429_v5  ;;  %2088 = vmatpush.msrb.mxu3 %v2425_v3  ;;  %v3372_v3 = vld [vmem:[#allocation31_spill] sm:$0xff] }
 0x260   :  { %v1441_v58 = vand.u32 4294901760, %v1440_v46  ;;  %2025 = vmatpush.msrb.mxu2 %v2463_v24 }
 0x261   :  { %1986 = vmatpush.msrb.mxu1 %v2431_v9  ;;  %2090 = vmatpush.msrb.mxu3 %v2427_v4  ;;  %v3373_v4 = vld [vmem:[#allocation34_spill] sm:$0xff] }
 0x262   :  { %1442 = vmatmul.f32.vlgmr.msrb.gmra.mxu0 %v1441_v58  ;;  %1742 = vmatmul.f32.vlgmr.msra.gmra.mxu1 %v1437_v17 }
 0x263   :  { %1927 = vmatpush.msrb.mxu0 %v2439_v14  ;;  %1988 = vmatpush.msrb.mxu1 %v2433_v10  ;;  %v3378_v14 = vld [vmem:[#allocation35_spill] sm:$0xff] }
 0x264   :  { %2092 = vmatpush.msrb.mxu3 %v2429_v5  ;;  %2029 = vmatpush.msrb.mxu2 %v2466_v25  ;;  %v3374_v5 = vld [vmem:[#allocation28_spill] sm:$0xff] }
 0x265   :  { %1930 = vmatpush.msrb.mxu0 %v2442_v15  ;;  %1990 = vmatpush.msrb.mxu1 %v2435_v11  ;;  %v3379_v15 = vld [vmem:[#allocation42_spill] sm:$0xff] }
 0x266   :  { %2094 = vmatpush.msrb.mxu3 %v2431_v9  ;;  %2033 = vmatpush.msrb.mxu2 %v2471_v27  ;;  %v3375_v9 = vld [vmem:[#allocation37_spill] sm:$0xff] }
 0x267   :  { %1933 = vmatpush.msrb.mxu0 %v2445_v16  ;;  %1992 = vmatpush.msrb.mxu1 %v2450_v19  ;;  %v3380_v16 = vld [vmem:[#allocation38_spill] sm:$0xff] }
 0x268   :  { %2096 = vmatpush.msrb.mxu3 %v2433_v10  ;;  %2037 = vmatpush.msrb.mxu2 %v2474_v28  ;;  %v3376_v10 = vld [vmem:[#allocation32_spill] sm:$0xff] }
 0x269   :  { %1936 = vmatpush.msrb.mxu0 %v2448_v18  ;;  %1994 = vmatpush.msrb.mxu1 %v2476_v29  ;;  %v1751_v18 = vld [vmem:[#allocation6 + $0x20] sm:$0xff] }
 0x26a   :  { %1705 = vmatmul.f32.vlgmr.msra.gmra.mxu0 %v1437_v17  ;;  %2098 = vmatpush.msrb.mxu3 %v2435_v11  ;;  %v3377_v11 = vld [vmem:[#allocation40_spill] sm:$0xff] }
 0x26b   :  { %1939 = vmatpush.msrb.mxu0 %v2453_v20  ;;  %1996 = vmatpush.msrb.mxu1 %v2501_v42 }
 0x26c   :  { %2100 = vmatpush.msrb.mxu3 %v2450_v19  ;;  %2041 = vmatpush.msrb.mxu2 %v2479_v30  ;;  %v1752_v19 = vld [vmem:[#allocation2] sm:$0xff] }
 0x26d   :  { %1942 = vmatpush.msrb.mxu0 %v2456_v21  ;;  %1998 = vmatpush.msrb.mxu1 %v2519_v51  ;;  %v1753_v20 = vmul.f32 %v1752_v19, %v1751_v18 }
 0x26e   :  { %2102 = vmatpush.msrb.mxu3 %v2476_v29  ;;  %2045 = vmatpush.msrb.mxu2 %v2514_v48 }
 0x26f   :  { %1945 = vmatpush.msrb.mxu0 %v2494_v37  ;;  %2000 = vmatpush.msrb.mxu1 %v2532_v57  ;;  %v1754_v25 = vrot.slane %v1753_v20, 4 }
 0x270   :  { %2104 = vmatpush.msrb.mxu3 %v2501_v42  ;;  %2049 = vmatpush.msrb.mxu2 %v2541_v60  ;;  %v1760_v60 = vsub.f32 -70.0, %v3115_v39 }
 0x271   :  { %1948 = vmatpush.msrb.mxu0 %v2522_v52  ;;  %2002 = vmatpush.msrb.mxu1 %v2546_v62  ;;  %v1755_v29 = vadd.f32 %v1754_v25, %v1753_v20 }
 0x272   :  { %2106 = vmatpush.msrb.mxu3 %v2519_v51  ;;  %2053 = vmatpush.msrb.mxu2 %v2563_v12  ;;  %v1761_v12 = vmul.f32 0.046569187, %v1760_v60 }
 0x273   :  { %1951 = vmatpush.msrb.mxu0 %v2544_v61  ;;  %2004 = vmatpush.msrb.mxu1 %v2565_v13  ;;  %v1756_v51 = vrot.slane %v1755_v29, 2 }
 0x274   :  { %2108 = vmatpush.msrb.mxu3 %v2532_v57  ;;  %2057 = vmatpush.msrb.mxu2 %v2579_v36  ;;  %v1762_v36 = vadd.f32 %v1761_v12, %v3115_v39 }
 0x275   :  { %1954 = vmatpush.msrb.mxu0 %v2555_v2  ;;  %2006 = vmatpush.msrb.mxu1 %v2581_v38 }
 0x276   :  { %2110 = vmatpush.msrb.mxu3 %v2546_v62  ;;  %2061 = vmatpush.msrb.mxu2 %v2594_v59  ;;  %v1757_v62 = vadd.f32 %v1756_v51, %v1755_v29 }
 0x277   :  { %1957 = vmatpush.msrb.mxu0 %v2572_v32  ;;  %2008 = vmatpush.msrb.mxu1 %v3319_v31 }
 0x278   :  { %2112 = vmatpush.msrb.mxu3 %v2565_v13  ;;  %2065 = vmatpush.msrb.mxu2 %v3320_v35  ;;  %v1758_v13 = vrot.slane %v1757_v62, 1 }
 0x279   :  { %1960 = vmatpush.msrb.mxu0 %v3321_v55  ;;  %2010 = vmatpush.msrb.mxu1 %v3372_v3 }
 0x27a   :  { %2114 = vmatpush.msrb.mxu3 %v2581_v38  ;;  %2069 = vmatpush.msrb.mxu2 %v3373_v4  ;;  %v1759_v59 = vadd.f32 %v1758_v13, %v1757_v62 }
 0x27b   :  { %1963 = vmatpush.msrb.mxu0 %v3374_v5 }
 0x27c   :  { %2116 = vmatpush.msrb.mxu3 %v3319_v31  ;;  %2073 = vmatpush.msrb.mxu2 %v3375_v9 }
 0x27d   :  { %1966 = vmatpush.msrb.mxu0 %v3376_v10 }
 0x27e   :  { %2118 = vmatpush.msrb.mxu3 %v3372_v3  ;;  %2077 = vmatpush.msrb.mxu2 %v3377_v11 }
 0x27f   :  { %1969 = vmatpush.msrb.mxu0 %v3378_v14 }
 0x280   :  { %2081 = vmatpush.msrb.mxu2 %v3379_v15 }
 0x281   :  { %1972 = vmatpush.msrb.mxu0 %v3380_v16 }
 0x2d7   :  { %v1544_v21 = vpop.f32.mrf.mxu1 }
 0x2df   :  { %v1443_v23 = vpop.f32.mrf.mxu0  ;;  %v1598_v27 = vpop.f32.mrf.mxu2 }
 0x2e0   :  { %v1545_v24 = vadd.f32 %v1544_v21, %v1443_v23  ;;  %v1743_v52 = vpop.f32.mrf.mxu1 }
 0x2e1   :  { %v1637_v30 = vpop.f32.mrf.mxu3 }
 0x2e2   :  { %v1599_v28 = vadd.f32 %v1598_v27, %v1545_v24 }
 0x2e4   :  { %v1638_v37 = vadd.f32 %v1637_v30, %v1599_v28 }
 0x2e7   :  { %v1706_v42 = vpop.f32.mrf.mxu0 }
 0x2e8   :  { %v1707_v48 = vadd.f32 %v1706_v42, %v1638_v37 }
 0x2ea   :  { %v1744_v57 = vadd.f32 %v1743_v52, %v1707_v48 }
 0x2ec   :  { %v1747_v61 = vrot.slane %v1744_v57, 4 }
 0x2ee   :  { %v1749_v2 = vadd.f32 %v1747_v61, %v2891_v26 }
 0x2f0   :  { %v1763_v32 = vmul.f32 1.8627676, %v1749_v2 }
 0x2f2   :  { %v1765_v38 = vrot.slane %v1763_v32, 3 }
 0x2f4   :  { %v1767_v31 = vadd.f32 %v1765_v38, %v1762_v36 }
 0x2f6   :  { %v1768_v35 = vsub.f32 %v1767_v31, %v1759_v59 }
 0x2f8   :  { %v2199_v55 = vadd.f32 70.0, %v1768_v35 }
 0x2fa   :  { %v1770_v53 = vmul.f32 %v2199_v55, %v3122_v6 }
 0x2fc   :  { %v3194_v7 = vsub.f32 %v1768_v35, %v1770_v53 }
 0x2fe   :  { %v1772_v47 = vsub.f32 %v3194_v7, %v3115_v39  ;;  %1775 = vst [vmem:[#allocation12 + $0x3] sm:$0x2] %v3194_v7  ;;  %v2200_v63 = vadd.f32 50.0, %v3194_v7  ;;  %v2138_v11 = vsub.f32 -70.0, %v3194_v7 }
 0x300   :  { %1773 = vst [vmem:[#allocation2 + $0x2] sm:$0x2] %v1772_v47  ;;  %vm1777_vm4 = vcmp.gt.f32.partialorder %v2200_v63, 0.0  ;;  %v2139_v18 = vmul.f32 0.046569187, %v2138_v11 }
 0x301   :  { %v2201_v22 = vsel %vm1777_vm4, 1.0, %v3318_v41  ;;  %v2129_v41 = vld [vmem:[#allocation6 + $0x28] sm:$0xff] }
 0x302   :  { %v1781_v8 = vrot.slane %v2201_v22, 1  ;;  %2152 = vst [vmem:[#allocation11 + $0x4] sm:$0x2] %v2201_v22  ;;  %v2140_v21 = vadd.f32 %v2139_v18, %v3194_v7 }
 0x303   :  { %2164 = dma.vmem_to_hbm [thread:$0]  %s2160_s17, 128, %s2162_s20, [#allocation5]  }
 0x304   :  { %v1815_v54 = vand.u32 4294901760, %v1781_v8 }
 0x306   :  { %1921 = vmatmul.f32.vlgmr.msra.gmra.mxu3 %v1815_v54  ;;  %v1816_v45 = vsub.f32 %v1781_v8, %v1815_v54 }
 0x307   :  { %v2130_v50 = vld [vmem:[#allocation2] sm:$0xff] }
 0x308   :  { %1975 = vmatmul.f32.vlgmr.msrb.gmra.mxu0 %v1816_v45  ;;  %v1817_v1 = vand.u32 4294901760, %v1816_v45  ;;  %v2131_v0 = vmul.f32 %v2130_v50, %v2129_v41 }
 0x30a   :  { %2014 = vmatmul.f32.vlgmr.msrb.gmra.mxu1 %v1817_v1  ;;  %v1818_v34 = vsub.f32 %v1816_v45, %v1817_v1  ;;  %v2132_v6 = vrot.slane %v2131_v0, 4 }
 0x30c   :  { %v1819_v33 = vand.u32 4294901760, %v1818_v34  ;;  %v2133_v49 = vadd.f32 %v2132_v6, %v2131_v0 }
 0x30e   :  { %1820 = vmatmul.f32.vlgmr.msra.gmra.mxu2 %v1819_v33  ;;  %2120 = vmatmul.f32.vlgmr.msrb.gmra.mxu3 %v1815_v54  ;;  %v2134_v5 = vrot.slane %v2133_v49, 2 }
 0x310   :  { %v2135_v15 = vadd.f32 %v2134_v5, %v2133_v49 }
 0x312   :  { %v2136_v19 = vrot.slane %v2135_v15, 1 }
 0x314   :  { %v2137_v24 = vadd.f32 %v2136_v19, %v2135_v15 }
 0x316   :  { %2083 = vmatmul.f32.vlgmr.msrb.gmra.mxu2 %v1815_v54 }
 0x385   :  { %v1976_v17 = vpop.f32.mrf.mxu0 }
 0x387   :  { %v2015_v46 = vpop.f32.mrf.mxu1 }
 0x389   :  { %v1922_v39 = vpop.f32.mrf.mxu3 }
 0x391   :  { %v1821_v40 = vpop.f32.mrf.mxu2  ;;  %v2121_v9 = vpop.f32.mrf.mxu3 }
 0x392   :  { %v1923_v44 = vadd.f32 %v1922_v39, %v1821_v40 }
 0x394   :  { %v1977_v56 = vadd.f32 %v1976_v17, %v1923_v44 }
 0x396   :  { %v2016_v58 = vadd.f32 %v2015_v46, %v1977_v56 }
 0x399   :  { %v2084_v3 = vpop.f32.mrf.mxu2 }
 0x39a   :  { %v2085_v4 = vadd.f32 %v2084_v3, %v2016_v58 }
 0x39c   :  { %v2122_v10 = vadd.f32 %v2121_v9, %v2085_v4 }
 0x39e   :  { %v2125_v14 = vrot.slane %v2122_v10, 3 }
 0x3a0   :  { %v2127_v16 = vadd.f32 %v2125_v14, %v2891_v26 }
 0x3a2   :  { %v2141_v20 = vmul.f32 1.8627676, %v2127_v16 }
 0x3a4   :  { %v2143_v23 = vrot.slane %v2141_v20, 4 }
 0x3a6   :  { %v2145_v25 = vadd.f32 %v2143_v23, %v2140_v21 }
 0x3a8   :  { %v2146_v27 = vsub.f32 %v2145_v25, %v2137_v24 }
 0x3aa   :  { %v2202_v28 = vadd.f32 70.0, %v2146_v27 }
 0x3ac   :  { %v2148_v29 = vmul.f32 %v2202_v28, %v2201_v22 }
 0x3ae   :  { %v2149_v30 = vsub.f32 %v2146_v27, %v2148_v29 }
 0x3b0   :  { %v2150_v26 = vsub.f32 %v2149_v30, %v3194_v7  ;;  %2153 = vst [vmem:[#allocation12 + $0x4] sm:$0x2] %v2149_v30 }
 0x3b1   :  { %2175 = dma.vmem_to_hbm [thread:$0]  %s2171_s21, 128, %s2173_s24, [#allocation13]  }
 0x3b2   :  { %2151 = vst [vmem:[#allocation2 + $0x3] sm:$0x2] %v2150_v26 }
 0x3b3   :  { %2364 = dma.done.wait [#allocation5], 128  }
 0x3b4   :  { %2365 = vsyncadd [#allocation5], 4294967168 }
 0x3b5   :  { %2366 = dma.done.wait [#allocation13], 128  }
 0x3b6   :  { %2367 = vsyncadd [#allocation13], 4294967168 }
 0x3b7   :  { %2184 = vsyncpa [#allocation4], 1 }
 0x3b8   :  { %2185 = vsyncpa [#allocation7], 1 }
 0x3b9   :  { %2186 = vsyncpa [#allocation10], 1 }
 0x3ba   :  { %2187 = vsyncpa [#allocation5], 1 }
 0x3bb   :  { %2188 = vsyncpa [#allocation13], 1 }

</bundles_post_ra>
